<compile_context>
chip_gen: v7x
topology: tpu7x:2x2x1
jax: 0.10.0
libtpu: 0.0.40
codegen_flags: <defaults>
</compile_context>

<pallas_src>
import functools

import numpy as np
import jax
import jax.numpy as jnp
from jax.experimental import pallas as pl
from jax.experimental.pallas import tpu as pltpu


def _round_up(v: int, m: int) -> int:
    return ((v + m - 1) // m) * m


def _readout_kernel(x_ref, w1_ref, e_ref, w2s_ref, w2v_ref, o_ref, *, S, G, act_cst):
    hp = jax.lax.Precision.HIGHEST
    # Upcast (no-op for f32, cheap VPU convert for bf16 -- hidden under the HBM read).
    x = x_ref[...].astype(jnp.float32)

    # linear_1 (scalar + vector paths) as one block-diagonal MXU matmul.
    h = jnp.dot(x, w1_ref[...], preferred_element_type=jnp.float32, precision=hp)
    s_pre = h[:, :S]               # pre-activation output scalars
    g_pre = h[:, S:S + G]          # pre-activation gates
    v = h[:, S + G:]               # vectors to be gated, flat (g, m) mul-major

    # e3nn Gate: normalize2mom-wrapped SiLU on scalars and gates.
    # (sigmoid-via-EUP micro-opt intentionally skipped: compute sits in slack.)
    s_act = act_cst * s_pre / (1.0 + jnp.exp(-s_pre))
    g_act = act_cst * g_pre / (1.0 + jnp.exp(-g_pre))

    # Broadcast each gate over its 3 vector components via a 0/1 matmul, then gate.
    g3 = jnp.dot(g_act, e_ref[...], preferred_element_type=jnp.float32, precision=hp)
    v_gated = v * g3

    # linear_2: scalar path -> column 0, vector path -> columns 1:4.
    out = (jnp.dot(s_act, w2s_ref[...], preferred_element_type=jnp.float32, precision=hp)
           + jnp.dot(v_gated, w2v_ref[...], preferred_element_type=jnp.float32, precision=hp))
    o_ref[...] = out.astype(o_ref.dtype)


def prepare_dipole_readout_weights(w1_s, w1_v, w2_s, w2_v):
    """Expand per-irrep o3.Linear weights into dense block matrices (call ONCE).

    w1_s : (C0, S+G)  linear_1 weight, 0e path (e3nn internal weight)
    w1_v : (C1, G)    linear_1 weight, 1o path
    w2_s : (S, 1)     linear_2 weight, 0e path
    w2_v : (G, 1)     linear_2 weight, 1o path
    The e3nn 1/sqrt(fan_in) path normalization is folded into the weights here so
    the per-call path is only the pallas_call.
    """
    f32 = jnp.float32
    C0, SG = w1_s.shape
    C1, G = w1_v.shape
    S = SG - G
    assert w2_s.shape == (S, 1) and w2_v.shape == (G, 1)
    eye3 = jnp.eye(3, dtype=f32)

    w1_scal = w1_s.astype(f32) * (1.0 / np.sqrt(C0))                       # (C0, S+G)
    w1_vec = jnp.kron(w1_v.astype(f32) * (1.0 / np.sqrt(C1)), eye3)        # (3C1, 3G)
    w1_big = jnp.concatenate(
        [jnp.concatenate([w1_scal, jnp.zeros((C0, 3 * G), f32)], axis=1),
         jnp.concatenate([jnp.zeros((3 * C1, S + G), f32), w1_vec], axis=1)],
        axis=0)                                                            # (C0+3C1, S+4G)

    e_mat = jnp.kron(jnp.eye(G, dtype=f32), jnp.ones((1, 3), f32))         # (G, 3G)

    w2s_big = jnp.concatenate([w2_s.astype(f32) * (1.0 / np.sqrt(S)),
                               jnp.zeros((S, 3), f32)], axis=1)            # (S, 4)
    w2v_big = jnp.concatenate(
        [jnp.zeros((3 * G, 1), f32),
         jnp.kron(w2_v.astype(f32) * (1.0 / np.sqrt(G)), eye3)], axis=1)   # (3G, 4)

    return {"w1": w1_big, "e": e_mat, "w2s": w2s_big, "w2v": w2v_big,
            "S": S, "G": G, "C0": C0, "C1": C1}


def nonlinear_dipole_readout(x, weights, *, act_cst, block_m=None, out_dtype=None,
                             vmem_limit_bytes=None):
    """Fused NonLinearDipoleReadoutBlock forward.

    x       : (M, C0 + 3*C1) node features in e3nn layout "C0x0e + C1x1o"
              (f32 or bf16; bf16 halves the dominant HBM read).
    weights : output of prepare_dipole_readout_weights.
    returns (M, 4) in layout "1x0e + 1x1o".
    """
    M, D_in = x.shape
    S, G = weights["S"], weights["G"]
    C0, C1 = weights["C0"], weights["C1"]
    assert D_in == C0 + 3 * C1, "input feature dim must be C0 + 3*C1"
    d_mid = S + 4 * G
    out_dtype = x.dtype if out_dtype is None else np.dtype(out_dtype)

    # --- node-tile size: big tiles amortize the ~0.35us per-grid-step overhead ---
    # (this kernel is purely bound by the HBM read of x). Defaults target v6e;
    # v5e stop at ~1024-2048, v7x push to 4096-8192 with bf16 x.
    if block_m is None:
        block_m = 2048
    block_m = _round_up(min(block_m, _round_up(M, 16)), 16)
    if M > 16 and block_m >= M:
        # keep >= 2 node tiles so v7x's two TensorCores both get work
        block_m = _round_up(pl.cdiv(M, 2), 16)
    assert block_m % 16 == 0

    # --- NO jnp.pad: ragged M handled by Pallas's masked last block ---
    n_blocks = pl.cdiv(M, block_m)

    # --- VMEM budget from the actual footprint (cap 48 MiB: legal on v7x's 64 MiB) ---
    if vmem_limit_bytes is None:
        x_tile = block_m * D_in * x.dtype.itemsize          # per input buffer
        out_tile = block_m * 128 * 4                         # lane-padded VMEM out buffer
        w_bytes = 4 * (D_in * d_mid + G * 3 * G + (S + 3 * G) * 4)
        tmp_bytes = block_m * (D_in + d_mid + 3 * G + 4) * 4  # f32 upcast + h + g3 + out
        need = 2 * (x_tile + out_tile) + w_bytes + tmp_bytes + (4 << 20)
        vmem_limit_bytes = int(min(48 << 20, max(32 << 20, need)))

    kernel = functools.partial(_readout_kernel, S=S, G=G, act_cst=float(act_cst))

    flops = 2 * M * (D_in * d_mid + G * 3 * G + S * 4 + 3 * G * 4)
    bytes_accessed = (M * D_in * x.dtype.itemsize + M * 4 * out_dtype.itemsize
                      + 4 * (D_in * d_mid + G * 3 * G + (S + 3 * G) * 4))

    out = pl.pallas_call(
        kernel,
        out_shape=jax.ShapeDtypeStruct((M, 4), out_dtype),
        grid=(n_blocks,),
        in_specs=[
            pl.BlockSpec((block_m, D_in), lambda i: (i, 0)),   # streamed node tile
            pl.BlockSpec((D_in, d_mid), lambda i: (0, 0)),     # W1 (resident)
            pl.BlockSpec((G, 3 * G), lambda i: (0, 0)),        # gate-broadcast 0/1 matrix
            pl.BlockSpec((S, 4), lambda i: (0, 0)),            # W2 scalar path
            pl.BlockSpec((3 * G, 4), lambda i: (0, 0)),        # W2 vector path
        ],
        out_specs=pl.BlockSpec((block_m, 4), lambda i: (i, 0)),
        compiler_params=pltpu.CompilerParams(
            dimension_semantics=("parallel",),
            vmem_limit_bytes=vmem_limit_bytes),
        cost_estimate=pl.CostEstimate(
            flops=flops,
            transcendentals=M * (S + G),
            bytes_accessed=bytes_accessed),
    )(x, weights["w1"], weights["e"], weights["w2s"], weights["w2v"])

    return out


if __name__ == "__main__":
    key = jax.random.PRNGKey(0)
    k_x, k1s, k1v, k2s, k2v = jax.random.split(key, 5)

    C0, C1 = 32, 32          # irreps_in  = "32x0e + 32x1o" -> feature dim 128
    S, G = 16, 16            # MLP_irreps = "16x0e + 16x1o"
    d_in = C0 + 3 * C1

    # normalize2mom constant for SiLU (e3nn wraps the gate activation with it):
    # c = (E_{z~N(0,1)}[silu(z)^2])^{-1/2}, via deterministic quadrature.
    zs = np.linspace(-12.0, 12.0, 200001)
    dz = zs[1] - zs[0]
    pdf = np.exp(-0.5 * zs * zs) / np.sqrt(2.0 * np.pi)
    silu_np = zs / (1.0 + np.exp(-zs))
    act_cst = float(1.0 / np.sqrt(np.sum(silu_np * silu_np * pdf) * dz))

    def rnd(k, shape):
        return jax.random.normal(k, shape, dtype=jnp.float32)

    w1_s = rnd(k1s, (C0, S + G))    # linear_1, 0e path (e3nn internal weight)
    w1_v = rnd(k1v, (C1, G))        # linear_1, 1o path
    w2_s = rnd(k2s, (S, 1))         # linear_2, 0e path
    w2_v = rnd(k2v, (G, 1))         # linear_2, 1o path
    weights = prepare_dipole_readout_weights(w1_s, w1_v, w2_s, w2_v)  # prepared ONCE

    def reference(x_f32):
        hp = jax.lax.Precision.HIGHEST
        xs = x_f32[:, :C0]
        xv = x_f32[:, C0:].reshape(-1, C1, 3)
        h_s = jnp.dot(xs, w1_s, precision=hp) / np.sqrt(C0)                    # (M, S+G)
        h_v = jnp.einsum('ncm,cg->ngm', xv, w1_v, precision=hp) / np.sqrt(C1)  # (M, G, 3)
        silu = lambda t: t / (1.0 + jnp.exp(-t))
        s_act = act_cst * silu(h_s[:, :S])
        g_act = act_cst * silu(h_s[:, S:])
        v_g = h_v * g_act[:, :, None]
        o_s = jnp.dot(s_act, w2_s, precision=hp) / np.sqrt(S)
        o_v = jnp.einsum('ngm,go->nom', v_g, w2_v, precision=hp)[:, 0, :] / np.sqrt(G)
        return jnp.concatenate([o_s, o_v], axis=-1)

    # --- test 1: f32 input, ragged node count (exercises Pallas masked last block,
    #             no wrapper-side padding, >=2 tiles) ---
    M1 = 200
    x1 = rnd(k_x, (M1, d_in))
    out1 = jax.block_until_ready(
        nonlinear_dipole_readout(x1, weights, act_cst=act_cst))
    ref1 = reference(x1)
    assert out1.shape == (M1, 4)
    err1 = float(jnp.max(jnp.abs(out1.astype(jnp.float32) - ref1)))
    assert err1 < 1e-3, f"f32 max abs err = {err1}"

    # --- test 2: bf16 streamed input (halves the dominant HBM read), f32 accumulation ---
    M2 = 256
    x2 = rnd(jax.random.fold_in(k_x, 1), (M2, d_in)).astype(jnp.bfloat16)
    out2 = jax.block_until_ready(
        nonlinear_dipole_readout(x2, weights, act_cst=act_cst,
                                 out_dtype=jnp.float32))
    ref2 = reference(x2.astype(jnp.float32))
    assert out2.shape == (M2, 4)
    err2 = float(jnp.max(jnp.abs(out2 - ref2)))
    assert err2 < 1e-3, f"bf16-input max abs err = {err2}"

    print("KERNEL_OK")
</pallas_src>

<mosaic_0001>
module attributes {stable_mosaic.version = 11 : i64} {
  func.func @_readout_kernel(%arg0: i32, %arg1: memref<112x128xf32, #tpu.memory_space<vmem>>, %arg2: memref<128x80xf32, #tpu.memory_space<vmem>>, %arg3: memref<16x48xf32, #tpu.memory_space<vmem>>, %arg4: memref<16x4xf32, #tpu.memory_space<vmem>>, %arg5: memref<48x4xf32, #tpu.memory_space<vmem>>, %arg6: memref<112x4xf32, #tpu.memory_space<vmem>>) attributes {dimension_semantics = [#tpu.dimension_semantics<parallel>], iteration_bounds = array<i64: 2>, scalar_prefetch = 0 : i64, scratch_operands = 0 : i64, tpu.core_type = #tpu.core_type<tc>, window_params = [{transform_indices = @transform_0, window_bounds = array<i64: 112, 128>}, {pipeline_mode = #tpu.pipeline_mode<synchronous>, transform_indices = @transform_1, window_bounds = array<i64: 128, 80>}, {pipeline_mode = #tpu.pipeline_mode<synchronous>, transform_indices = @transform_2, window_bounds = array<i64: 16, 48>}, {pipeline_mode = #tpu.pipeline_mode<synchronous>, transform_indices = @transform_3, window_bounds = array<i64: 16, 4>}, {pipeline_mode = #tpu.pipeline_mode<synchronous>, transform_indices = @transform_4, window_bounds = array<i64: 48, 4>}, {transform_indices = @transform_5, window_bounds = array<i64: 112, 4>}]} {
    %c0 = arith.constant 0 : index
    %c0_0 = arith.constant 0 : index
    %0 = vector.load %arg1[%c0, %c0_0] : memref<112x128xf32, #tpu.memory_space<vmem>>, vector<112x128xf32>
    %c0_1 = arith.constant 0 : index
    %c0_2 = arith.constant 0 : index
    %1 = vector.load %arg2[%c0_1, %c0_2] : memref<128x80xf32, #tpu.memory_space<vmem>>, vector<128x80xf32>
    %cst = arith.constant dense<0.000000e+00> : vector<112x80xf32>
    %2 = tpu.matmul %0, %1, %cst {dimension_numbers = #tpu.dot_dimension_numbers<[1], [0], [0], [1], [0, 0, 1, 1], [], []>, precision = #tpu.contract_precision<fp32>} : vector<112x128xf32>, vector<128x80xf32>, vector<112x80xf32> -> vector<112x80xf32>
    %3 = vector.extract_strided_slice %2 {offsets = [0, 0], sizes = [112, 16], strides = [1, 1]} : vector<112x80xf32> to vector<112x16xf32>
    %4 = vector.extract_strided_slice %2 {offsets = [0, 16], sizes = [112, 16], strides = [1, 1]} : vector<112x80xf32> to vector<112x16xf32>
    %5 = vector.extract_strided_slice %2 {offsets = [0, 32], sizes = [112, 48], strides = [1, 1]} : vector<112x80xf32> to vector<112x48xf32>
    %cst_3 = arith.constant 1.67653251 : f32
    %6 = vector.broadcast %cst_3 : f32 to vector<112x16xf32>
    %7 = arith.mulf %6, %3 : vector<112x16xf32>
    %cst_4 = arith.constant 0.000000e+00 : f32
    %8 = vector.broadcast %cst_4 : f32 to vector<112x16xf32>
    %9 = arith.subf %8, %3 : vector<112x16xf32>
    %10 = math.exp %9 : vector<112x16xf32>
    %cst_5 = arith.constant 1.000000e+00 : f32
    %11 = vector.broadcast %cst_5 : f32 to vector<112x16xf32>
    %12 = arith.addf %11, %10 : vector<112x16xf32>
    %13 = arith.divf %7, %12 : vector<112x16xf32>
    %cst_6 = arith.constant 1.67653251 : f32
    %14 = vector.broadcast %cst_6 : f32 to vector<112x16xf32>
    %15 = arith.mulf %14, %4 : vector<112x16xf32>
    %cst_7 = arith.constant 0.000000e+00 : f32
    %16 = vector.broadcast %cst_7 : f32 to vector<112x16xf32>
    %17 = arith.subf %16, %4 : vector<112x16xf32>
    %18 = math.exp %17 : vector<112x16xf32>
    %cst_8 = arith.constant 1.000000e+00 : f32
    %19 = vector.broadcast %cst_8 : f32 to vector<112x16xf32>
    %20 = arith.addf %19, %18 : vector<112x16xf32>
    %21 = arith.divf %15, %20 : vector<112x16xf32>
    %c0_9 = arith.constant 0 : index
    %c0_10 = arith.constant 0 : index
    %22 = vector.load %arg3[%c0_9, %c0_10] : memref<16x48xf32, #tpu.memory_space<vmem>>, vector<16x48xf32>
    %cst_11 = arith.constant dense<0.000000e+00> : vector<112x48xf32>
    %23 = tpu.matmul %21, %22, %cst_11 {dimension_numbers = #tpu.dot_dimension_numbers<[1], [0], [0], [1], [0, 0, 1, 1], [], []>, precision = #tpu.contract_precision<fp32>} : vector<112x16xf32>, vector<16x48xf32>, vector<112x48xf32> -> vector<112x48xf32>
    %24 = arith.mulf %5, %23 : vector<112x48xf32>
    %c0_12 = arith.constant 0 : index
    %c0_13 = arith.constant 0 : index
    %25 = vector.load %arg4[%c0_12, %c0_13] : memref<16x4xf32, #tpu.memory_space<vmem>>, vector<16x4xf32>
    %cst_14 = arith.constant dense<0.000000e+00> : vector<112x4xf32>
    %26 = tpu.matmul %13, %25, %cst_14 {dimension_numbers = #tpu.dot_dimension_numbers<[1], [0], [0], [1], [0, 0, 1, 1], [], []>, precision = #tpu.contract_precision<fp32>} : vector<112x16xf32>, vector<16x4xf32>, vector<112x4xf32> -> vector<112x4xf32>
    %c0_15 = arith.constant 0 : index
    %c0_16 = arith.constant 0 : index
    %27 = vector.load %arg5[%c0_15, %c0_16] : memref<48x4xf32, #tpu.memory_space<vmem>>, vector<48x4xf32>
    %cst_17 = arith.constant dense<0.000000e+00> : vector<112x4xf32>
    %28 = tpu.matmul %24, %27, %cst_17 {dimension_numbers = #tpu.dot_dimension_numbers<[1], [0], [0], [1], [0, 0, 1, 1], [], []>, precision = #tpu.contract_precision<fp32>} : vector<112x48xf32>, vector<48x4xf32>, vector<112x4xf32> -> vector<112x4xf32>
    %29 = arith.addf %26, %28 : vector<112x4xf32>
    %c0_18 = arith.constant 0 : index
    %c0_19 = arith.constant 0 : index
    %30 = vector.load %arg6[%c0_18, %c0_19] : memref<112x4xf32, #tpu.memory_space<vmem>>, vector<112x4xf32>
    tpu.vector_store %arg6[%c0_18, %c0_19], %29 {strides = array<i32>} : memref<112x4xf32, #tpu.memory_space<vmem>>, vector<112x4xf32>,
    return
  }
  func.func @transform_0(%arg0: i32) -> (i32, i32) {
    %c0_i32 = arith.constant 0 : i32
    %c0_i32_0 = arith.constant 0 : i32
    return %arg0, %c0_i32 : i32, i32
  }
  func.func @transform_1(%arg0: i32) -> (i32, i32) {
    %c0_i32 = arith.constant 0 : i32
    %c0_i32_0 = arith.constant 0 : i32
    %c0_i32_1 = arith.constant 0 : i32
    return %c0_i32, %c0_i32_0 : i32, i32
  }
  func.func @transform_2(%arg0: i32) -> (i32, i32) {
    %c0_i32 = arith.constant 0 : i32
    %c0_i32_0 = arith.constant 0 : i32
    %c0_i32_1 = arith.constant 0 : i32
    return %c0_i32, %c0_i32_0 : i32, i32
  }
  func.func @transform_3(%arg0: i32) -> (i32, i32) {
    %c0_i32 = arith.constant 0 : i32
    %c0_i32_0 = arith.constant 0 : i32
    %c0_i32_1 = arith.constant 0 : i32
    return %c0_i32, %c0_i32_0 : i32, i32
  }
  func.func @transform_4(%arg0: i32) -> (i32, i32) {
    %c0_i32 = arith.constant 0 : i32
    %c0_i32_0 = arith.constant 0 : i32
    %c0_i32_1 = arith.constant 0 : i32
    return %c0_i32, %c0_i32_0 : i32, i32
  }
  func.func @transform_5(%arg0: i32) -> (i32, i32) {
    %c0_i32 = arith.constant 0 : i32
    %c0_i32_0 = arith.constant 0 : i32
    return %arg0, %c0_i32 : i32, i32
  }
}

</mosaic_0001>

<bundles_post_ra>
// kernel: tpu_custom_call.1
= control target key start
LH: loop header
LB: loop body
LE: loop exit
PB: predicated region body
PF: predicated region fallthrough
CT: control target
= control target key end

     0   :  { %s7422_s18 = smov 0   ;;  %s7424_s19 = smov 0   ;;  %s9189_s0 = inlined_call_operand.vmem [shape: f32[200,128], index: 0, kind: input, shape index: {}]   ;;  %s9190_s1 = inlined_call_operand.vmem [shape: f32[128,80], index: 1, kind: input, shape index: {}]   ;;  %s9191_s2 = inlined_call_operand.vmem [shape: f32[16,48], index: 2, kind: input, shape index: {}]   ;;  %s9192_s3 = inlined_call_operand.vmem [shape: f32[16,4], index: 3, kind: input, shape index: {}]   ;;  %s9193_s4 = inlined_call_operand.vmem [shape: f32[48,4], index: 4, kind: input, shape index: {}]   ;;  %s9194_s5 = inlined_call_operand.vmem [shape: f32[200,4], index: 5, kind: output, shape index: {}]  }
   0x1   :  { %s7426_s20 = smov 0  }
   0x2 LB: > { %s7435_s21 = sadd.s32 4294967295, %s7355_s20   ;;  %s7437_s22 = sadd.s32 1, %s7355_s20   ;;  %s7355_s20 = sphi %s7426_s20, %s9398_s20   ;;  %s7351_s19 = sphi %s7424_s19, %s9397_s19   ;;  %s7347_s18 = sphi %s7422_s18, %s9396_s18  }
   0x3   : > { %s129_s23 = ssub.s32 %s7355_s20, %s7437_s22  ;;  %s132_s24 = sadd.s32 1, %s7351_s19 }
   0x4   : > { %p130_p0 = scmp.eq.s32.totalorder %s129_s23, 0  ;;  %p142_p1 = scmp.ne.s32.totalorder %s7351_s19, %s7347_s18 }
   0x5   : > { %p143_p2 = scmp.eq.s32.totalorder %s7435_s21, 1  ;;  %p5217_p3 = scmp.ge.s32.totalorder %s7355_s20, 1 }
   0x6   : > { %s7445_s25 = scalar_select %p130_p0, %s7351_s19, %s132_s24  }
   0x7   : > { %p7447_p4 = por %p143_p2, %p142_p1  ;;  %p196_p5 = scmp.lt.s32.totalorder %s7355_s20, 3 }
   0x9   : > { %p197_p6 = pnand %p5217_p3, %p196_p5 }
   0xb   : > { %200 = sbr.rel (%p197_p6) target bundleno = 1793 (0x701), region = 40 }
  0x12   : > { %v260_v0 = vld [vmem:[%s9190_s1] sm:$0xff]  ;;  %v261_v1 = vld [vmem:[%s9190_s1 + $0x8] sm:$0xff]  ;;  %v262_v2 = vld [vmem:[%s9190_s1 + $0x10] sm:$0xff]  ;;  %s7461_s8 = smul.u32 14, %s7435_s21  ;;  %s7389_s7 = smov 112   ;;  %vm1618_vm0 = vcmask 130048  }
  0x13   : > { %v277_v3 = vand.u32 4294901760, %v260_v0  ;;  %v280_v4 = vand.u32 4294901760, %v261_v1  ;;  %v263_v5 = vld [vmem:[%s9190_s1 + $0x18] sm:$0xff]  ;;  %v283_v6 = vand.u32 4294901760, %v262_v2  ;;  %v264_v7 = vld [vmem:[%s9190_s1 + $0x20] sm:$0xff]  ;;  %v265_v8 = vld [vmem:[%s9190_s1 + $0x28] sm:$0xff] }
  0x14   : > { %v286_v9 = vand.u32 4294901760, %v263_v5  ;;  %v289_v11 = vand.u32 4294901760, %v264_v7  ;;  %v292_v12 = vand.u32 4294901760, %v265_v8  ;;  %v266_v14 = vld [vmem:[%s9190_s1 + $0x30] sm:$0xff]  ;;  %v7482_v15 = vld [vmem:[%s9190_s1 + $0x38] sm:$0xff]  ;;  %p232_p7 = scmp.lt.s32.totalorder %s7461_s8, 24 }
  0x15   : > { %v7472_v10 = vpack.c.bf16 %v280_v4, %v277_v3  ;;  %v295_v17 = vand.u32 4294901760, %v266_v14  ;;  %v298_v18 = vand.u32 4294901760, %v7482_v15  ;;  %v7495_v19 = vld [vmem:[%s9190_s1 + $0x40] sm:$0xff]  ;;  %v7500_v20 = vld [vmem:[%s9190_s1 + $0x48] sm:$0xff]  ;;  %v7505_v21 = vld [vmem:[%s9190_s1 + $0x50] sm:$0xff]  ;;  %v7517_v23 = vsub.f32 %v260_v0, %v277_v3  ;;  %s7390_s9 = smov 32  }
  0x16   : > { %v7474_v13 = vpack.c.bf16 %v286_v9, %v283_v6  ;;  %s233_s23 = scalar_select %p232_p7, %s7461_s8, 24  ;;  %v7489_v16 = vpack.c.bf16 %v292_v12, %v289_v11  ;;  %v7510_v22 = vld [vmem:[%s9190_s1 + $0x58] sm:$0xff]  ;;  %v301_v24 = vand.u32 4294901760, %v7495_v19  ;;  %v7522_v26 = vsub.f32 %v261_v1, %v280_v4  ;;  %v7541_v36 = vld [vmem:[%s9190_s1 + $0x60] sm:$0xff]  ;;  %v7546_v37 = vld [vmem:[%s9190_s1 + $0x68] sm:$0xff] }
  0x17   : > { %6541 = vmatprep.subr.bf16.mxu0 %v7472_v10  ;;  %v7524_v27 = vsub.f32 %v262_v2, %v283_v6  ;;  %v7527_v28 = vpack.c.bf16 %v298_v18, %v295_v17  ;;  %v304_v29 = vand.u32 4294901760, %v7500_v20  ;;  %v7533_v32 = vsub.f32 %v263_v5, %v286_v9  ;;  %v7582_v52 = vld [vmem:[%s9190_s1 + $0x70] sm:$0xff]  ;;  %v7587_v53 = vld [vmem:[%s9190_s1 + $0x78] sm:$0xff]  ;;  %s7391_s28 = smov 96   ;;  %s5231_s12 = smul.u32 (%p7447_p4), 112, %s7435_s21 }
  0x18   : > { %9276 = vst [vmem:[#allocation3_spill] sm:$0xff] %v7474_v13  ;;  %6543 = vmatpush3.bf16.msra.mxu0 %v7472_v10  ;;  %9277 = vst [vmem:[#allocation4_spill] sm:$0xff] %v7489_v16  ;;  %s5218_s30 = sshll.u32 %s233_s23, 3  ;;  %v307_v33 = vand.u32 4294901760, %v7505_v21  ;;  %v310_v34 = vand.u32 4294901760, %v7510_v22  ;;  %v9200_v39 = vand.u32 4294901760, %v7517_v23  ;;  %v7552_v40 = vsub.f32 %v264_v7, %v289_v11 }
  0x19   : > { %6545 = vmatprep.subr.bf16.mxu0 %v7474_v13  ;;  %s7515_s13 = scalar_lea.vmem %s9189_s0, %s5218_s30  ;;  %9278 = vst [vmem:[#allocation5_spill] sm:$0xff] %v7527_v28  ;;  %v9199_v41 = vand.u32 4294901760, %v7522_v26  ;;  %v9198_v43 = vand.u32 4294901760, %v7524_v27  ;;  %v7564_v44 = vpack.c.bf16 %v304_v29, %v301_v24  ;;  %v9197_v46 = vand.u32 4294901760, %v7533_v32  ;;  %s9105_s15 = scalar_lea.vmem (%p7447_p4), %s9194_s5, %s5231_s12  }
  0x1a   : > { %v246_v25 = vld [vmem:[%s7515_s13] sm:$0xff]  ;;  %v247_v31 = vld [vmem:[%s7515_s13 + $0x8] sm:$0xff]  ;;  %v248_v35 = vld [vmem:[%s7515_s13 + $0x10] sm:$0xff]  ;;  %v7574_v48 = vpack.c.bf16 %v310_v34, %v307_v33  ;;  %v9209_v49 = vand.u32 4294901760, %v7541_v36  ;;  %v9207_v50 = vand.u32 4294901760, %v7546_v37  ;;  %v501_v55 = vsub.f32 %v7517_v23, %v9200_v39 }
  0x1b   : > { %v7530_v30 = vand.u32 4294901760, %v246_v25  ;;  %v7556_v42 = vand.u32 4294901760, %v247_v31  ;;  %9279 = vst [vmem:[#allocation6_spill] sm:$0xff] %v7564_v44  ;;  %v7568_v47 = vand.u32 4294901760, %v248_v35  ;;  %v249_v51 = vld [vmem:[%s7515_s13 + $0x18] sm:$0xff]  ;;  %v9196_v56 = vand.u32 4294901760, %v7552_v40 }
  0x1c   : > { %6547 = vmatpush3.bf16.msra.mxu0 %v7474_v13  ;;  %9280 = vst [vmem:[#allocation7_spill] sm:$0xff] %v7574_v48  ;;  %v7596_v57 = vsub.f32 %v265_v8, %v292_v12  ;;  %v250_v58 = vld [vmem:[%s7515_s13 + $0x20] sm:$0xff]  ;;  %v508_v59 = vsub.f32 %v7522_v26, %v9199_v41  ;;  %v515_v61 = vsub.f32 %v7524_v27, %v9198_v43  ;;  %v7618_v2 = vand.u32 4294901760, %v249_v51  ;;  %v251_v11 = vld [vmem:[%s7515_s13 + $0x28] sm:$0xff] }
  0x1d   : > { %6549 = vmatprep.subr.bf16.mxu0 %v7489_v16  ;;  %v7549_v38 = vsub.f32 %v246_v25, %v7530_v30  ;;  %v7604_v60 = vsub.f32 %v247_v31, %v7556_v42  ;;  %v7609_v62 = vsub.f32 %v266_v14, %v295_v17  ;;  %v522_v0 = vsub.f32 %v7533_v32, %v9197_v46  ;;  %v253_v25 = vld [vmem:[%s7515_s13 + $0x38] sm:$0xff] }
  0x1e   : > { %v7616_v1 = vsub.f32 %v248_v35, %v7568_v47  ;;  %v9205_v3 = vand.u32 4294901760, %v7582_v52  ;;  %v9203_v4 = vand.u32 4294901760, %v7587_v53  ;;  %v7622_v5 = vand.u32 4294901760, %v250_v58 }
  0x1f   : > { %v9195_v45 = vand.u32 4294901760, %v7549_v38  ;;  %v7625_v6 = vsub.f32 %v7482_v15, %v298_v18  ;;  %v7631_v7 = vpack.c.bf16 %v9207_v50, %v9209_v49  ;;  %v502_v8 = vand.u32 4294901760, %v501_v55  ;;  %v252_v18 = vld [vmem:[%s7515_s13 + $0x30] sm:$0xff] }
  0x20   : > { %6551 = vmatpush3.bf16.msra.mxu0 %v7489_v16  ;;  %9281 = vst [vmem:[#allocation8_spill] sm:$0xff] %v7616_v1  ;;  %v7636_v9 = vsub.f32 %v7552_v40, %v9196_v56  ;;  %v509_v12 = vand.u32 4294901760, %v508_v59  ;;  %v9201_v14 = vand.u32 4294901760, %v7604_v60  ;;  %v516_v15 = vand.u32 4294901760, %v515_v61 }
  0x21   : > { %6553 = vmatprep.subr.bf16.mxu0 %v7527_v28  ;;  %v360_v54 = vsub.f32 %v7549_v38, %v9195_v45  ;;  %9282 = vst [vmem:[#allocation9_spill] sm:$0xff] %v7631_v7  ;;  %v9202_v17 = vand.u32 4294901760, %v7596_v57  ;;  %v523_v31 = vand.u32 4294901760, %v522_v0  ;;  %v9204_v35 = vand.u32 4294901760, %v7616_v1 }
  0x22   : > { %v9206_v55 = vand.u32 4294901760, %v7609_v62  ;;  %v7655_v59 = vpack.c.bf16 %v9203_v4, %v9205_v3  ;;  %v7658_v61 = vsub.f32 %v250_v58, %v7622_v5  ;;  %v9208_v45 = vand.u32 4294901760, %v7625_v6 }
  0x23   : > { %v361_v63 = vand.u32 4294901760, %v360_v54  ;;  %v7647_v54 = vsub.f32 %v249_v51, %v7618_v2  ;;  %v7661_v0 = vand.u32 4294901760, %v251_v11  ;;  %v530_v56 = vand.u32 4294901760, %v7636_v9 }
  0x24   : > { %6555 = vmatpush3.bf16.msra.mxu0 %v7527_v28  ;;  %9284 = vst [vmem:[#allocation11_spill] sm:$0xff] %v7655_v59  ;;  %9285 = vst [vmem:[#allocation12_spill] sm:$0xff] %v7658_v61  ;;  %v7664_v51 = vand.u32 4294901760, %v252_v18  ;;  %v7669_v46 = vsub.f32 %v7495_v19, %v301_v24  ;;  %v7671_v43 = vand.u32 4294901760, %v253_v25  ;;  %v6572_v58 = vpack.c.bf16 %v509_v12, %v502_v8 }
  0x25   : > { %6557 = vmatprep.subr.bf16.mxu0 %v7564_v44  ;;  %5756 = vmatprep.mubr.f32.mxu0 %v361_v63  ;;  %9283 = vst [vmem:[#allocation10_spill] sm:$0xff] %v7647_v54  ;;  %v254_v63 = vld [vmem:[%s7515_s13 + $0x40] sm:$0xff]  ;;  %v370_v41 = vsub.f32 %v7604_v60, %v9201_v14  ;;  %v536_v9 = vsub.f32 %v7596_v57, %v9202_v17  ;;  %v9210_v8 = vand.u32 4294901760, %v7647_v54  ;;  %v9215_v14 = vand.u32 4294901760, %v7658_v61 }
  0x26   : > { %v7680_v39 = vand.u32 4294901760, %v254_v63  ;;  %v7683_v19 = vpack.c.bf16 %v523_v31, %v516_v15  ;;  %v380_v24 = vsub.f32 %v7616_v1, %v9204_v35  ;;  %v543_v12 = vsub.f32 %v7609_v62, %v9206_v55  ;;  %v255_v31 = vld [vmem:[%s7515_s13 + $0x48] sm:$0xff]  ;;  %v256_v35 = vld [vmem:[%s7515_s13 + $0x50] sm:$0xff] }
  0x27   : > { %v550_v17 = vsub.f32 %v7625_v6, %v9208_v45  ;;  %v7697_v4 = vsub.f32 %v251_v11, %v7661_v0  ;;  %v7702_v15 = vsub.f32 %v7500_v20, %v304_v29  ;;  %v7707_v3 = vsub.f32 %v252_v18, %v7664_v51 }
  0x28   : > { %6559 = vmatpush3.bf16.msra.mxu0 %v7564_v44  ;;  %v7711_v50 = vsub.f32 %v253_v25, %v7671_v43  ;;  %v7716_v11 = vsub.f32 %v7505_v21, %v307_v33  ;;  %v371_v20 = vand.u32 4294901760, %v370_v41  ;;  %v537_v29 = vand.u32 4294901760, %v536_v9 }
  0x29   : > { %6561 = vmatprep.subr.bf16.mxu0 %v7574_v48  ;;  %9286 = vst [vmem:[#allocation13_spill] sm:$0xff] %v7697_v4  ;;  %9287 = vst [vmem:[#allocation14_spill] sm:$0xff] %v7707_v3  ;;  %v7720_v45 = vsub.f32 %v254_v63, %v7680_v39  ;;  %v7725_v18 = vsub.f32 %v7510_v22, %v310_v34  ;;  %v390_v25 = vsub.f32 %v7647_v54, %v9210_v8  ;;  %v257_v34 = vld [vmem:[%s7515_s13 + $0x58] sm:$0xff]  ;;  %vm2785_vm1 = vcmask 392192  }
  0x2a   : > { %9288 = vst [vmem:[#allocation15_spill] sm:$0xff] %v7711_v50  ;;  %v544_v21 = vand.u32 4294901760, %v543_v12  ;;  %v7731_v33 = vand.u32 4294901760, %v255_v31  ;;  %v7733_v49 = vand.u32 4294901760, %v256_v35  ;;  %v400_v41 = vsub.f32 %v7658_v61, %v9215_v14 }
  0x2b   : > { %9289 = vst [vmem:[#allocation16_spill] sm:$0xff] %v7720_v45  ;;  %v551_v63 = vand.u32 4294901760, %v550_v17  ;;  %v9290_v8 = vand.u32 4294901760, %v7669_v46  ;;  %v381_v17 = vand.u32 4294901760, %v380_v24  ;;  %v6580_v14 = vpack.c.bf16 %v537_v29, %v530_v56 }
  0x2c   : > { %6563 = vmatpush3.bf16.msra.mxu0 %v7574_v48  ;;  %v577_v22 = vand.u32 4294901760, %v7725_v18  ;;  %v391_v44 = vand.u32 4294901760, %v390_v25  ;;  %v7753_v55 = vsub.f32 %v255_v31, %v7731_v33  ;;  %v7758_v28 = vand.u32 4294901760, %v257_v34 }
  0x2d   : > { %6565 = vmatprep.subr.bf16.mxu0 %v7631_v7  ;;  %v7745_v12 = vsub.f32 %v7669_v46, %v9290_v8  ;;  %v7756_v8 = vsub.f32 %v256_v35, %v7733_v49  ;;  %v401_v48 = vand.u32 4294901760, %v400_v41  ;;  %v9293_v56 = vand.u32 4294901760, %v7697_v4 }
  0x2e   : > { %9291 = vst [vmem:[#allocation17_spill] sm:$0xff] %v7753_v55  ;;  %v9294_v29 = vand.u32 4294901760, %v7702_v15  ;;  %v9295_v31 = vand.u32 4294901760, %v7707_v3  ;;  %v9296_v16 = vand.u32 4294901760, %v7711_v50  ;;  %v9302_v61 = vand.u32 4294901760, %v7587_v53 }
  0x2f   : > { %9292 = vst [vmem:[#allocation18_spill] sm:$0xff] %v7756_v8  ;;  %v410_v24 = vsub.f32 %v7697_v4, %v9293_v56  ;;  %v558_v9 = vand.u32 4294901760, %v7745_v12  ;;  %v9298_v56 = vand.u32 4294901760, %v7720_v45  ;;  %v9313_v1 = vand.u32 4294901760, %v7609_v62 }
  0x30   : > { %6567 = vmatpush3.bf16.msra.mxu0 %v7631_v7  ;;  %v258_v7 = vld [vmem:[%s7515_s13 + $0x60] sm:$0xff]  ;;  %v564_v25 = vsub.f32 %v7702_v15, %v9294_v29  ;;  %v420_v35 = vsub.f32 %v7707_v3, %v9295_v31  ;;  %v430_v41 = vsub.f32 %v7711_v50, %v9296_v16  ;;  %v578_v29 = vsub.f32 %v7725_v18, %v577_v22  ;;  %v259_v16 = vld [vmem:[%s7515_s13 + $0x68] sm:$0xff] }
  0x31   : > { %6569 = vmatprep.subr.bf16.mxu0 %v7655_v59  ;;  %v9299_v31 = vand.u32 4294901760, %v7541_v36  ;;  %v7786_v3 = vand.u32 4294901760, %v258_v7  ;;  %v411_v50 = vand.u32 4294901760, %v410_v24  ;;  %vm4930_vm2 = vcmask 31744  }
  0x32   : > { %v431_v54 = vand.u32 4294901760, %v430_v41  ;;  %v579_v24 = vand.u32 4294901760, %v578_v29 }
  0x33   : > { %v7784_v12 = vsub.f32 %v7541_v36, %v9299_v31  ;;  %v565_v36 = vand.u32 4294901760, %v564_v25  ;;  %v9301_v31 = vand.u32 4294901760, %v7582_v52 }
  0x34   : > { %6571 = vmatpush3.bf16.msra.mxu0 %v7655_v59  ;;  %v6584_v59 = vpack.c.bf16 %v551_v63, %v544_v21  ;;  %v9297_v21 = vand.u32 4294901760, %v7716_v11 }
  0x35   : > { %6573 = vmatprep.subr.bf16.mxu0 %v6572_v58  ;;  %v7803_v4 = vsub.f32 %v7582_v52, %v9301_v31  ;;  %v584_v25 = vand.u32 4294901760, %v7784_v12  ;;  %v7815_v52 = vsub.f32 %v258_v7, %v7786_v3  ;;  %v9305_v7 = vand.u32 4294901760, %v7517_v23 }
  0x36   : > { %v571_v63 = vsub.f32 %v7716_v11, %v9297_v21  ;;  %v7808_v21 = vsub.f32 %v7587_v53, %v9302_v61  ;;  %v9303_v53 = vand.u32 4294901760, %v7753_v55  ;;  %v9304_v61 = vand.u32 4294901760, %v7756_v8 }
  0x37   : > { %5757 = vmatmul.mubr.f32.vlgmr.msra.gmra.mrb[0].mxu0 %v371_v20  ;;  %v440_v20 = vsub.f32 %v7720_v45, %v9298_v56  ;;  %v7798_v45 = vsub.f32 %v257_v34, %v7758_v28  ;;  %v9308_v31 = vand.u32 4294901760, %v7524_v27 }
  0x38   : > { %6575 = vmatpush3.bf16.msra.mxu0 %v6572_v58  ;;  %5759 = vmatprep.mubr.f32.mxu0 %v381_v17  ;;  %v9300_v17 = vand.u32 4294901760, %v7546_v37  ;;  %v421_v58 = vand.u32 4294901760, %v420_v35  ;;  %v460_v35 = vsub.f32 %v7756_v8, %v9304_v61  ;;  %v9311_v8 = vand.u32 4294901760, %v7596_v57 }
  0x39   : > { %6577 = vmatprep.subr.bf16.mxu0 %v7683_v19  ;;  %v441_v34 = vand.u32 4294901760, %v440_v20  ;;  %v9306_v20 = vand.u32 4294901760, %v7522_v26 }
  0x3a   : > { %v7795_v56 = vsub.f32 %v7546_v37, %v9300_v17  ;;  %v572_v37 = vand.u32 4294901760, %v571_v63  ;;  %v7810_v17 = vand.u32 4294901760, %v259_v16  ;;  %v605_v63 = vand.u32 4294901760, %v7808_v21 }
  0x3b   : > { %5760 = vmatmul.mubr.f32.gmra.mrb[2].mxu0 %v391_v44  ;;  %v450_v44 = vsub.f32 %v7753_v55, %v9303_v53  ;;  %v7831_v29 = vpack.c.bf16 %v9306_v20, %v9305_v7  ;;  %v9309_v53 = vand.u32 4294901760, %v7533_v32  ;;  %v9314_v7 = vand.u32 4294901760, %v7625_v6 }
  0x3c   : > { %6579 = vmatpush3.bf16.msra.mxu0 %v7683_v19  ;;  %5762 = vmatprep.mubr.f32.mxu0 %v401_v48  ;;  %v591_v41 = vand.u32 4294901760, %v7795_v56  ;;  %v598_v19 = vand.u32 4294901760, %v7803_v4  ;;  %v7840_v61 = vsub.f32 %v259_v16, %v7810_v17  ;;  %v9310_v48 = vand.u32 4294901760, %v7552_v40 }
  0x3d   : > { %6581 = vmatprep.subr.bf16.mxu0 %v6580_v14  ;;  %9307 = vst [vmem:[#allocation19_spill] sm:$0xff] %v7831_v29  ;;  %v7837_v55 = vpack.c.bf16 %v9309_v53, %v9308_v31  ;;  %v7852_v20 = vpack.c.bf16 %v9314_v7, %v9313_v1  ;;  %v9316_v29 = vand.u32 4294901760, %v7669_v46  ;;  %v9317_v31 = vand.u32 4294901760, %v7702_v15 }
  0x3e   : > { %v7846_v13 = vpack.c.bf16 %v9311_v8, %v9310_v48  ;;  %v479_v16 = vand.u32 4294901760, %v7815_v52  ;;  %v9318_v53 = vand.u32 4294901760, %v7716_v11  ;;  %v7865_v48 = vpack.c.bf16 %v591_v41, %v584_v25 }
  0x3f   : > { %5763 = vmatmul.mubr.f32.gmra.mrb[4].mxu0 %v411_v50  ;;  %9315 = vst [vmem:[#allocation21_spill] sm:$0xff] %v7852_v20  ;;  %v7858_v50 = vpack.c.bf16 %v9317_v31, %v9316_v29  ;;  %v6588_v1 = vpack.c.bf16 %v565_v36, %v558_v9  ;;  %v585_v7 = vsub.f32 %v7784_v12, %v584_v25  ;;  %v451_v29 = vand.u32 4294901760, %v450_v44 }
  0x40   : > { %9312 = vst [vmem:[#allocation20_spill] sm:$0xff] %v7846_v13  ;;  %6583 = vmatpush3.bf16.msra.mxu0 %v6580_v14  ;;  %5765 = vmatprep.mubr.f32.mxu0 %v421_v58  ;;  %v7863_v8 = vpack.c.bf16 %v577_v22, %v9318_v53  ;;  %v7867_v13 = vpack.c.bf16 %v605_v63, %v598_v19  ;;  %v9319_v14 = vand.u32 4294901760, %v7798_v45  ;;  %v489_v31 = vand.u32 4294901760, %v7840_v61 }
  0x41   : > { %6585 = vmatprep.subr.bf16.mxu0 %v6584_v59  ;;  %v592_v20 = vsub.f32 %v7795_v56, %v591_v41  ;;  %v6592_v22 = vpack.c.bf16 %v579_v24, %v572_v37  ;;  %v461_v53 = vand.u32 4294901760, %v460_v35  ;;  %v480_v9 = vsub.f32 %v7815_v52, %v479_v16 }
  0x42   : > { %v470_v58 = vsub.f32 %v7798_v45, %v9319_v14  ;;  %v586_v36 = vand.u32 4294901760, %v585_v7  ;;  %v606_v44 = vsub.f32 %v7808_v21, %v605_v63  ;;  %v6604_v63 = vpack.c.bf16 %v7522_v26, %v7517_v23  ;;  %v9332_v14 = vld [vmem:[#allocation18_spill] sm:$0xff] }
  0x43   : > { %5766 = vmatmul.mubr.f32.gmra.mrb[6].mxu0 %v431_v54  ;;  %v593_v25 = vand.u32 4294901760, %v592_v20  ;;  %v599_v54 = vsub.f32 %v7803_v4, %v598_v19  ;;  %v481_v37 = vand.u32 4294901760, %v480_v9  ;;  %v6608_v20 = vpack.c.bf16 %v7533_v32, %v7524_v27  ;;  %v9336_v9 = vld [vmem:[#allocation11_spill] sm:$0xff] }
  0x44   : > { %6587 = vmatpush3.bf16.msra.mxu0 %v6584_v59  ;;  %5768 = vmatprep.mubr.f32.mxu0 %v441_v34  ;;  %v471_v41 = vand.u32 4294901760, %v470_v58  ;;  %v490_v59 = vsub.f32 %v7840_v61, %v489_v31  ;;  %v607_v35 = vand.u32 4294901760, %v606_v44  ;;  %v6616_v23 = vpack.c.bf16 %v7625_v6, %v7609_v62  ;;  %v9322_v62 = vld [vmem:[#allocation10_spill] sm:$0xff]  ;;  %v9324_v6 = vld [vmem:[#allocation4_spill] sm:$0xff]  ;;  %v9333_v58 = vld [vmem:[#allocation7_spill] sm:$0xff] }
  0x45   : > { %6589 = vmatprep.subr.bf16.mxu0 %v6588_v1  ;;  %v6596_v34 = vpack.c.bf16 %v593_v25, %v586_v36  ;;  %v600_v24 = vand.u32 4294901760, %v599_v54  ;;  %v6620_v26 = vpack.c.bf16 %v7702_v15, %v7669_v46  ;;  %v6624_v27 = vpack.c.bf16 %v7725_v18, %v7716_v11  ;;  %v9320_v46 = vld [vmem:[#allocation8_spill] sm:$0xff]  ;;  %v9325_v15 = vld [vmem:[#allocation13_spill] sm:$0xff]  ;;  %v9326_v11 = vld [vmem:[#allocation14_spill] sm:$0xff] }
  0x46   : > { %v491_v7 = vand.u32 4294901760, %v490_v59  ;;  %v6628_v32 = vpack.c.bf16 %v7795_v56, %v7784_v12  ;;  %v9327_v18 = vld [vmem:[#allocation5_spill] sm:$0xff]  ;;  %v9328_v12 = vld [vmem:[#allocation15_spill] sm:$0xff]  ;;  %v9330_v56 = vld [vmem:[#allocation6_spill] sm:$0xff]  ;;  %v9338_v25 = vand.u32 4294901760, %v7604_v60  ;;  %v9339_v54 = vand.u32 4294901760, %v9320_v46 }
  0x47   : > { %5769 = vmatmul.mubr.f32.gmra.mrb[8].mxu0 %v451_v29  ;;  %v6600_v19 = vpack.c.bf16 %v607_v35, %v600_v24  ;;  %v9331_v29 = vld [vmem:[#allocation17_spill] sm:$0xff]  ;;  %v9337_v36 = vld [vmem:[#allocation19_spill] sm:$0xff]  ;;  %v9340_v44 = vand.u32 4294901760, %v9322_v62  ;;  %v9344_v59 = vand.u32 4294901760, %v9326_v11  ;;  %v9349_v35 = vand.u32 4294901760, %v9332_v14 }
  0x48   : > { %6591 = vmatpush3.bf16.msra.mxu0 %v6588_v1  ;;  %5771 = vmatprep.mubr.f32.mxu0 %v461_v53  ;;  %v6612_v1 = vpack.c.bf16 %v7596_v57, %v7552_v40  ;;  %v6632_v40 = vpack.c.bf16 %v7808_v21, %v7803_v4  ;;  %v9321_v57 = vld [vmem:[#allocation3_spill] sm:$0xff]  ;;  %v9323_v4 = vld [vmem:[#allocation12_spill] sm:$0xff]  ;;  %v9335_v53 = vand.u32 4294901760, %v7549_v38  ;;  %v9348_v24 = vand.u32 4294901760, %v9331_v29 }
  0x49   : > { %6593 = vmatprep.subr.bf16.mxu0 %v6592_v22  ;;  %v9329_v21 = vld [vmem:[#allocation16_spill] sm:$0xff] }
  0x4b   : > { %5772 = vmatmul.mubr.f32.gmra.mrb[10].mxu0 %v471_v41  ;;  %v9342_v41 = vld [vmem:[#allocation20_spill] sm:$0xff] }
  0x4c   : > { %6595 = vmatpush3.bf16.msra.mxu0 %v6592_v22  ;;  %5774 = vmatprep.mubr.f32.mxu0 %v481_v37  ;;  %v9334_v22 = vld [vmem:[#allocation9_spill] sm:$0xff] }
  0x4d   : > { %6597 = vmatprep.subr.bf16.mxu0 %v6596_v34  ;;  %v9345_v37 = vld [vmem:[#allocation21_spill] sm:$0xff] }
  0x4f   : > { %5775 = vmatmul.mubr.f32.gmra.mrb[12].mxu0 %v491_v7  ;;  %v9350_v7 = vand.u32 4294901760, %v7798_v45 }
  0x50   : > { %6599 = vmatpush3.bf16.msra.mxu0 %v6596_v34  ;;  %5809 = vmatprep.mubr.f32.mxu0 %v7530_v30  ;;  %v9346_v34 = vand.u32 4294901760, %v9328_v12 }
  0x51   : > { %6601 = vmatprep.subr.bf16.mxu0 %v6600_v19 }
  0x54   : > { %6603 = vmatpush3.bf16.msra.mxu0 %v6600_v19 }
  0x55   : > { %6605 = vmatprep.subr.bf16.mxu0 %v6604_v63 }
  0x57   : > { %5810 = vmatmul.mubr.f32.vlgmr.msra.gmra.mrb[0].mxu0 %v7556_v42 }
  0x58   : > { %6607 = vmatpush3.bf16.msra.mxu0 %v6604_v63  ;;  %5812 = vmatprep.mubr.f32.mxu0 %v7568_v47 }
  0x59   : > { %6609 = vmatprep.subr.bf16.mxu0 %v6608_v20 }
  0x5b   : > { %5813 = vmatmul.mubr.f32.gmra.mrb[2].mxu0 %v7618_v2 }
  0x5c   : > { %6611 = vmatpush3.bf16.msra.mxu0 %v6608_v20  ;;  %5815 = vmatprep.mubr.f32.mxu0 %v7622_v5 }
  0x5d   : > { %6613 = vmatprep.subr.bf16.mxu0 %v6612_v1 }
  0x5f   : > { %5816 = vmatmul.mubr.f32.gmra.mrb[4].mxu0 %v7661_v0 }
  0x60   : > { %6615 = vmatpush3.bf16.msra.mxu0 %v6612_v1  ;;  %5818 = vmatprep.mubr.f32.mxu0 %v7664_v51 }
  0x61   : > { %6617 = vmatprep.subr.bf16.mxu0 %v6616_v23 }
  0x63   : > { %5819 = vmatmul.mubr.f32.gmra.mrb[6].mxu0 %v7671_v43 }
  0x64   : > { %6619 = vmatpush3.bf16.msra.mxu0 %v6616_v23  ;;  %5821 = vmatprep.mubr.f32.mxu0 %v7680_v39 }
  0x65   : > { %6621 = vmatprep.subr.bf16.mxu0 %v6620_v26 }
  0x67   : > { %5822 = vmatmul.mubr.f32.gmra.mrb[8].mxu0 %v7731_v33 }
  0x68   : > { %6623 = vmatpush3.bf16.msra.mxu0 %v6620_v26  ;;  %5824 = vmatprep.mubr.f32.mxu0 %v7733_v49 }
  0x69   : > { %6625 = vmatprep.subr.bf16.mxu0 %v6624_v27 }
  0x6b   : > { %5825 = vmatmul.mubr.f32.gmra.mrb[10].mxu0 %v7758_v28 }
  0x6c   : > { %6627 = vmatpush3.bf16.msra.mxu0 %v6624_v27  ;;  %5827 = vmatprep.mubr.f32.mxu0 %v7786_v3 }
  0x6d   : > { %6629 = vmatprep.subr.bf16.mxu0 %v6628_v32 }
  0x6f   : > { %5828 = vmatmul.mubr.f32.gmra.mrb[12].mxu0 %v7810_v17 }
  0x70   : > { %6631 = vmatpush3.bf16.msra.mxu0 %v6628_v32  ;;  %5862 = vmatprep.mubr.f32.mxu0 %v7549_v38  ;;  %v9341_v38 = vand.u32 4294901760, %v9323_v4 }
  0x71   : > { %6633 = vmatprep.subr.bf16.mxu0 %v6632_v40 }
  0x74   : > { %6635 = vmatpush3.bf16.msra.mxu0 %v6632_v40 }
  0x75   : > { %6637 = vmatprep.subr.bf16.mxu0 %v7472_v10 }
  0x77   : > { %5863 = vmatmul.mubr.f32.vlgmr.msra.gmra.mrb[0].mxu0 %v7604_v60  ;;  %v9343_v60 = vand.u32 4294901760, %v9325_v15 }
  0x78   : > { %6639 = vmatpush3.bf16.msra.mxu0 %v7472_v10  ;;  %5865 = vmatprep.mubr.f32.mxu0 %v9320_v46 }
  0x79   : > { %6641 = vmatprep.subr.bf16.mxu0 %v9321_v57 }
  0x7b   : > { %5866 = vmatmul.mubr.f32.gmra.mrb[2].mxu0 %v9322_v62 }
  0x7c   : > { %6643 = vmatpush3.bf16.msra.mxu0 %v9321_v57  ;;  %5868 = vmatprep.mubr.f32.mxu0 %v9323_v4 }
  0x7d   : > { %6645 = vmatprep.subr.bf16.mxu0 %v9324_v6 }
  0x7f   : > { %5869 = vmatmul.mubr.f32.gmra.mrb[4].mxu0 %v9325_v15 }
  0x80   : > { %6647 = vmatpush3.bf16.msra.mxu0 %v9324_v6  ;;  %5871 = vmatprep.mubr.f32.mxu0 %v9326_v11 }
  0x81   : > { %6649 = vmatprep.subr.bf16.mxu0 %v9327_v18 }
  0x83   : > { %5872 = vmatmul.mubr.f32.gmra.mrb[6].mxu0 %v9328_v12 }
  0x84   : > { %6651 = vmatpush3.bf16.msra.mxu0 %v9327_v18  ;;  %5874 = vmatprep.mubr.f32.mxu0 %v9329_v21 }
  0x85   : > { %6653 = vmatprep.subr.bf16.mxu0 %v9330_v56 }
  0x87   : > { %5875 = vmatmul.mubr.f32.gmra.mrb[8].mxu0 %v9331_v29 }
  0x88   : > { %6655 = vmatpush3.bf16.msra.mxu0 %v9330_v56  ;;  %5877 = vmatprep.mubr.f32.mxu0 %v9332_v14 }
  0x89   : > { %6657 = vmatprep.subr.bf16.mxu0 %v9333_v58 }
  0x8b   : > { %5878 = vmatmul.mubr.f32.gmra.mrb[10].mxu0 %v7798_v45 }
  0x8c   : > { %6659 = vmatpush3.bf16.msra.mxu0 %v9333_v58  ;;  %5880 = vmatprep.mubr.f32.mxu0 %v7815_v52 }
  0x8d   : > { %6661 = vmatprep.subr.bf16.mxu0 %v9334_v22 }
  0x8f   : > { %5881 = vmatmul.mubr.f32.gmra.mrb[12].mxu0 %v7840_v61 }
  0x90   : > { %6663 = vmatpush3.bf16.msra.mxu0 %v9334_v22  ;;  %5915 = vmatprep.mubr.f32.mxu0 %v9335_v53 }
  0x91   : > { %6665 = vmatprep.subr.bf16.mxu0 %v9336_v9 }
  0x94   : > { %6667 = vmatpush3.bf16.msra.mxu0 %v9336_v9 }
  0x95   : > { %6669 = vmatprep.subr.bf16.mxu0 %v9337_v36 }
  0x97   : > { %5916 = vmatmul.mubr.f32.vlgmr.msra.gmra.mrb[0].mxu0 %v9338_v25 }
  0x98   : > { %6671 = vmatpush3.bf16.msra.mxu0 %v9337_v36  ;;  %5918 = vmatprep.mubr.f32.mxu0 %v9339_v54 }
  0x99   : > { %6673 = vmatprep.subr.bf16.mxu0 %v7837_v55 }
  0x9b   : > { %5919 = vmatmul.mubr.f32.gmra.mrb[2].mxu0 %v9340_v44 }
  0x9c   : > { %6675 = vmatpush3.bf16.msra.mxu0 %v7837_v55  ;;  %5921 = vmatprep.mubr.f32.mxu0 %v9341_v38  ;;  %v9347_v55 = vand.u32 4294901760, %v9329_v21 }
  0x9d   : > { %6677 = vmatprep.subr.bf16.mxu0 %v9342_v41 }
  0x9f   : > { %5922 = vmatmul.mubr.f32.gmra.mrb[4].mxu0 %v9343_v60 }
  0xa0   : > { %6679 = vmatpush3.bf16.msra.mxu0 %v9342_v41  ;;  %5924 = vmatprep.mubr.f32.mxu0 %v9344_v59 }
  0xa1   : > { %6681 = vmatprep.subr.bf16.mxu0 %v9345_v37 }
  0xa3   : > { %5925 = vmatmul.mubr.f32.gmra.mrb[6].mxu0 %v9346_v34 }
  0xa4   : > { %6683 = vmatpush3.bf16.msra.mxu0 %v9345_v37  ;;  %5927 = vmatprep.mubr.f32.mxu0 %v9347_v55 }
  0xa5   : > { %6685 = vmatprep.subr.bf16.mxu0 %v7858_v50 }
  0xa7   : > { %5928 = vmatmul.mubr.f32.gmra.mrb[8].mxu0 %v9348_v24 }
  0xa8   : > { %6687 = vmatpush3.bf16.msra.mxu0 %v7858_v50  ;;  %5930 = vmatprep.mubr.f32.mxu0 %v9349_v35 }
  0xa9   : > { %6689 = vmatprep.subr.bf16.mxu0 %v7863_v8 }
  0xab   : > { %5931 = vmatmul.mubr.f32.gmra.mrb[10].mxu0 %v9350_v7 }
  0xac   : > { %6691 = vmatpush3.bf16.msra.mxu0 %v7863_v8  ;;  %5933 = vmatprep.mubr.f32.mxu0 %v479_v16 }
  0xad   : > { %6693 = vmatprep.subr.bf16.mxu0 %v7865_v48 }
  0xaf   : > { %5934 = vmatmul.mubr.f32.gmra.mrb[12].mxu0 %v489_v31 }
  0xb0   : > { %6695 = vmatpush3.bf16.msra.mxu0 %v7865_v48  ;;  %5968 = vmatprep.mubr.f32.mxu0 %v7530_v30 }
  0xb1   : > { %6697 = vmatprep.subr.bf16.mxu0 %v7867_v13 }
  0xb4   : > { %6699 = vmatpush3.bf16.msra.mxu0 %v7867_v13  ;;  %v8039_v13 = vld [vmem:[%s9191_s2 + $0x8] sm:$0xff] }
  0xb5   : > { %6701 = vmatprep.subr.bf16.mxu0 %v7472_v10 }
  0xb7   : > { %5969 = vmatmul.mubr.f32.vlgmr.msra.gmra.mrb[0].mxu0 %v7556_v42 }
  0xb8   : > { %6703 = vmatpush3.bf16.msra.mxu0 %v7472_v10  ;;  %5971 = vmatprep.mubr.f32.mxu0 %v7568_v47  ;;  %v8034_v10 = vld [vmem:[%s9191_s2] sm:$0xff] }
  0xb9   : > { %6705 = vmatprep.subr.bf16.mxu0 %v9321_v57 }
  0xbb   : > { %5972 = vmatmul.mubr.f32.gmra.mrb[2].mxu0 %v7618_v2 }
  0xbc   : > { %6707 = vmatpush3.bf16.msra.mxu0 %v9321_v57  ;;  %5974 = vmatprep.mubr.f32.mxu0 %v7622_v5 }
  0xbd   : > { %6709 = vmatprep.subr.bf16.mxu0 %v9324_v6 }
  0xbf   : > { %5975 = vmatmul.mubr.f32.gmra.mrb[4].mxu0 %v7661_v0 }
  0xc0   : > { %6711 = vmatpush3.bf16.msra.mxu0 %v9324_v6  ;;  %5977 = vmatprep.mubr.f32.mxu0 %v7664_v51 }
  0xc1   : > { %6713 = vmatprep.subr.bf16.mxu0 %v9327_v18 }
  0xc3   : > { %5978 = vmatmul.mubr.f32.gmra.mrb[6].mxu0 %v7671_v43 }
  0xc4   : > { %6715 = vmatpush3.bf16.msra.mxu0 %v9327_v18  ;;  %5980 = vmatprep.mubr.f32.mxu0 %v7680_v39 }
  0xc5   : > { %6717 = vmatprep.subr.bf16.mxu0 %v9330_v56 }
  0xc7   : > { %5981 = vmatmul.mubr.f32.gmra.mrb[8].mxu0 %v7731_v33 }
  0xc8   : > { %6719 = vmatpush3.bf16.msra.mxu0 %v9330_v56  ;;  %5983 = vmatprep.mubr.f32.mxu0 %v7733_v49 }
  0xc9   : > { %6721 = vmatprep.subr.bf16.mxu0 %v9333_v58 }
  0xcb   : > { %5984 = vmatmul.mubr.f32.gmra.mrb[10].mxu0 %v7758_v28 }
  0xcc   : > { %6723 = vmatpush3.bf16.msra.mxu0 %v9333_v58  ;;  %5986 = vmatprep.mubr.f32.mxu0 %v7786_v3 }
  0xcd   : > { %6725 = vmatprep.subr.bf16.mxu0 %v9334_v22 }
  0xcf   : > { %5987 = vmatmul.mubr.f32.gmra.mrb[12].mxu0 %v7810_v17 }
  0xd0   : > { %6727 = vmatpush3.bf16.msra.mxu0 %v9334_v22  ;;  %6021 = vmatprep.mubr.f32.mxu0 %v7530_v30  ;;  %v1648_v30 = vand.u32 4294901760, %v8034_v10 }
  0xd1   : > { %6729 = vmatprep.subr.bf16.mxu0 %v9336_v9 }
  0xd4   : > { %6731 = vmatpush3.bf16.msra.mxu0 %v9336_v9 }
  0xd7   : > { %6022 = vmatmul.mubr.f32.vlgmr.msra.gmra.mrb[0].mxu0 %v7556_v42 }
  0xd8   : > { %6024 = vmatprep.mubr.f32.mxu0 %v7568_v47 }
  0xdb   : > { %6025 = vmatmul.mubr.f32.gmra.mrb[2].mxu0 %v7618_v2 }
  0xdc   : > { %6027 = vmatprep.mubr.f32.mxu0 %v7622_v5 }
  0xdf   : > { %6028 = vmatmul.mubr.f32.gmra.mrb[4].mxu0 %v7661_v0 }
  0xe0   : > { %6030 = vmatprep.mubr.f32.mxu0 %v7664_v51 }
  0xe3   : > { %6031 = vmatmul.mubr.f32.gmra.mrb[6].mxu0 %v7671_v43 }
  0xe4   : > { %6033 = vmatprep.mubr.f32.mxu0 %v7680_v39  ;;  %v1651_v39 = vand.u32 4294901760, %v8039_v13 }
  0xe7   : > { %6034 = vmatmul.mubr.f32.gmra.mrb[8].mxu0 %v7731_v33 }
  0xe8   : > { %6036 = vmatprep.mubr.f32.mxu0 %v7733_v49 }
  0xeb   : > { %6037 = vmatmul.mubr.f32.gmra.mrb[10].mxu0 %v7758_v28  ;;  %v8047_v28 = vpack.c.bf16 %v1651_v39, %v1648_v30 }
  0xec   : > { %6039 = vmatprep.mubr.f32.mxu0 %v7786_v3 }
  0xed   : > { %6733 = vmatprep.subr.bf16.mxu0 %v8047_v28  ;;  %6852 = vmatprep.subr.bf16.mxu1 %v8047_v28 }
  0xee   : > { %6735 = vmatpush3.bf16.msra.mxu0 %v8047_v28  ;;  %6853 = vmatpush3.bf16.msra.mxu1 %v8047_v28 }
  0xef   : > { %6040 = vmatmul.mubr.f32.gmra.mrb[12].mxu0 %v7810_v17 }
 0x1aa   : > { %v8053_v42 = vpop.f32.mrb[0].mxu0 }
 0x1ab   : > { %v1491_v43 = vsub.f32 0.0, %v8053_v42  ;;  %v8056_v45 = vpop.f32.mrb[1].mxu0 }
 0x1ac   : > { %v1490_v47 = vsub.f32 0.0, %v8056_v45  ;;  %v1476_v35 = vmul.f32 1.6765325, %v8056_v45 }
 0x1ad   : > { %v1506_v49 = vmul.f32 1.442695, %v1491_v43 }
 0x1ae   : > { %v1504_v2 = vmul.f32 1.442695, %v1490_v47  ;;  %v8059_v3 = vpop.f32.mrb[2].mxu0 }
 0x1af   : > { %7241 = vpow2.f32 %v1506_v49  ;;  %v1493_v5 = vsub.f32 0.0, %v8059_v3  ;;  %v8062_v0 = vpop.f32.mrb[3].mxu0 }
 0x1b0   : > { %7243 = vpow2.f32 %v1504_v2  ;;  %v1492_v51 = vsub.f32 0.0, %v8062_v0 }
 0x1b1   : > { %v1510_v33 = vmul.f32 1.442695, %v1493_v5 }
 0x1b2   : > { %v1508_v17 = vmul.f32 1.442695, %v1492_v51  ;;  %v8065_v52 = vpop.f32.mrb[4].mxu0  ;;  %v1477_v51 = vmul.f32 1.6765325, %v8053_v42 }
 0x1b3   : > { %7245 = vpow2.f32 %v1510_v33  ;;  %v1495_v61 = vsub.f32 0.0, %v8065_v52  ;;  %v8068_v50 = vpop.f32.mrb[5].mxu0 }
 0x1b4   : > { %7247 = vpow2.f32 %v1508_v17  ;;  %v1494_v16 = vsub.f32 0.0, %v8068_v50  ;;  %v1478_v17 = vmul.f32 1.6765325, %v8062_v0 }
 0x1b5   : > { %v1514_v8 = vmul.f32 1.442695, %v1495_v61 }
 0x1b6   : > { %v1512_v48 = vmul.f32 1.442695, %v1494_v16  ;;  %v8071_v31 = vpop.f32.mrb[6].mxu0 }
 0x1b7   : > { %7249 = vpow2.f32 %v1514_v8  ;;  %v1497_v19 = vsub.f32 0.0, %v8071_v31  ;;  %v8074_v63 = vpop.f32.mrb[7].mxu0 }
 0x1b8   : > { %7251 = vpow2.f32 %v1512_v48  ;;  %v1496_v20 = vsub.f32 0.0, %v8074_v63 }
 0x1b9   : > { %v7242_v1 = vpop.eup %7241  ;;  %v1518_v23 = vmul.f32 1.442695, %v1497_v19 }
 0x1ba   : > { %v7244_v26 = vpop.eup %7243  ;;  %v1533_v27 = vadd.f32 1.0, %v7242_v1  ;;  %v1516_v32 = vmul.f32 1.442695, %v1496_v20  ;;  %v8077_v40 = vpop.f32.mrb[8].mxu0 }
 0x1bb   : > { %v1532_v46 = vadd.f32 1.0, %v7244_v26  ;;  %7253 = vpow2.f32 %v1518_v23  ;;  %v1499_v57 = vsub.f32 0.0, %v8077_v40  ;;  %v8080_v62 = vpop.f32.mrb[9].mxu0  ;;  %v1479_v23 = vmul.f32 1.6765325, %v8059_v3 }
 0x1bc   : > { %7255 = vrcp.f32 %v1533_v27  ;;  %v1498_v4 = vsub.f32 0.0, %v8080_v62  ;;  %v1480_v26 = vmul.f32 1.6765325, %v8068_v50 }
 0x1bd   : > { %v7246_v6 = vpop.eup %7245  ;;  %7257 = vrcp.f32 %v1532_v46  ;;  %v1522_v15 = vmul.f32 1.442695, %v1499_v57 }
 0x1be   : > { %v7248_v11 = vpop.eup %7247  ;;  %v1535_v18 = vadd.f32 1.0, %v7246_v6  ;;  %7259 = vpow2.f32 %v1516_v32  ;;  %v1520_v12 = vmul.f32 1.442695, %v1498_v4  ;;  %v8083_v21 = vpop.f32.mrb[10].mxu0 }
 0x1bf   : > { %v1534_v56 = vadd.f32 1.0, %v7248_v11  ;;  %7261 = vpow2.f32 %v1522_v15  ;;  %v1501_v29 = vsub.f32 0.0, %v8083_v21  ;;  %v8086_v14 = vpop.f32.mrb[11].mxu0  ;;  %v8119_v11 = vsub.f32 %v8034_v10, %v1648_v30 }
 0x1c0   : > { %7263 = vrcp.f32 %v1535_v18  ;;  %v1500_v58 = vsub.f32 0.0, %v8086_v14  ;;  %v1481_v18 = vmul.f32 1.6765325, %v8065_v52 }
 0x1c1   : > { %v7250_v22 = vpop.eup %7249  ;;  %7265 = vrcp.f32 %v1534_v56  ;;  %v1526_v53 = vmul.f32 1.442695, %v1501_v29  ;;  %v9254_v10 = vand.u32 4294901760, %v8119_v11 }
 0x1c2   : > { %v7252_v9 = vpop.eup %7251  ;;  %v1537_v36 = vadd.f32 1.0, %v7250_v22  ;;  %7267 = vpow2.f32 %v1520_v12  ;;  %v1524_v25 = vmul.f32 1.442695, %v1500_v58  ;;  %v8089_v54 = vpop.f32.mrb[12].mxu0  ;;  %v8129_v12 = vsub.f32 %v8039_v13, %v1651_v39 }
 0x1c3   : > { %v1536_v44 = vadd.f32 1.0, %v7252_v9  ;;  %7269 = vpow2.f32 %v1526_v53  ;;  %v1503_v38 = vsub.f32 0.0, %v8089_v54  ;;  %v8092_v41 = vpop.f32.mrb[13].mxu0  ;;  %v1482_v58 = vmul.f32 1.6765325, %v8074_v63 }
 0x1c4   : > { %7271 = vrcp.f32 %v1537_v36  ;;  %v1502_v60 = vsub.f32 0.0, %v8092_v41  ;;  %v9253_v9 = vand.u32 4294901760, %v8129_v12  ;;  %v1483_v13 = vmul.f32 1.6765325, %v8071_v31 }
 0x1c5   : > { %v7254_v59 = vpop.eup %7253  ;;  %7273 = vrcp.f32 %v1536_v44  ;;  %v1530_v37 = vmul.f32 1.442695, %v1503_v38 }
 0x1c6   : > { %v7256_v34 = vpop.eup %7255  ;;  %v1539_v55 = vadd.f32 1.0, %v7254_v59  ;;  %7275 = vpow2.f32 %v1524_v25  ;;  %v1528_v24 = vmul.f32 1.442695, %v1502_v60  ;;  %v1858_v25 = vsub.f32 %v8119_v11, %v9254_v10 }
 0x1c7   : > { %v7258_v7 = vpop.eup %7257  ;;  %7277 = vpow2.f32 %v1530_v37  ;;  %v8102_v8 = vmul.f32 %v7256_v34, %v1477_v51  ;;  %v1865_v44 = vsub.f32 %v8129_v12, %v9253_v9  ;;  %v1484_v59 = vmul.f32 1.6765325, %v8080_v62 }
 0x1c8   : > { %v7260_v43 = vpop.eup %7259  ;;  %v8096_v47 = vmul.f32 %v7258_v7, %v1476_v35  ;;  %7279 = vpow2.f32 %v1528_v24  ;;  %v1859_v38 = vand.u32 4294901760, %v1858_v25  ;;  %v1485_v24 = vmul.f32 1.6765325, %v8077_v40 }
 0x1c9   : > { %v7262_v49 = vpop.eup %7261  ;;  %v1538_v2 = vadd.f32 1.0, %v7260_v43  ;;  %7281 = vrcp.f32 %v1539_v55  ;;  %v1866_v34 = vand.u32 4294901760, %v1865_v44  ;;  %v1487_v51 = vmul.f32 1.6765325, %v8083_v21 }
 0x1ca   : > { %v7264_v5 = vpop.eup %7263  ;;  %v1541_v33 = vadd.f32 1.0, %v7262_v49  ;;  %1590 = vrot.lane.b32.xlu0 %v8096_v47, %s7389_s7  ;;  %v1486_v49 = vmul.f32 1.6765325, %v8086_v14 }
 0x1cb   : > { %v7266_v61 = vpop.eup %7265  ;;  %7283 = vrcp.f32 %v1538_v2  ;;  %v8112_v57 = vmul.f32 %v7264_v5, %v1479_v23  ;;  %v8157_v7 = vpack.c.bf16 %v1866_v34, %v1859_v38 }
 0x1cc   : > { %v7268_v16 = vpop.eup %7267  ;;  %v8104_v48 = vmul.f32 %v7266_v61, %v1478_v17  ;;  %7285 = vrcp.f32 %v1541_v33  ;;  %v1488_v17 = vmul.f32 1.6765325, %v8092_v41 }
 0x1cd   : > { %v7270_v19 = vpop.eup %7269  ;;  %v1540_v20 = vadd.f32 1.0, %v7268_v16  ;;  %6737 = vmatprep.subr.bf16.mxu0 %v8157_v7 }
 0x1ce   : > { %v7272_v1 = vpop.eup %7271  ;;  %v1543_v27 = vadd.f32 1.0, %v7270_v19  ;;  %1592 = vrot.lane.b32.xlu0 %v8102_v8, %s7389_s7  ;;  %1594 = vrot.lane.b32.xlu1 %v8104_v48, %s7389_s7 }
 0x1cf   : > { %v7274_v32 = vpop.eup %7273  ;;  %7287 = vrcp.f32 %v1540_v20  ;;  %v8133_v53 = vmul.f32 %v7272_v1, %v1481_v18  ;;  %v1489_v1 = vmul.f32 1.6765325, %v8089_v54 }
 0x1d0   : > { %v7276_v46 = vpop.eup %7275  ;;  %v8114_v4 = vmul.f32 %v7274_v32, %v1480_v26  ;;  %7289 = vrcp.f32 %v1543_v27  ;;  %v8186_v26 = vpack.c.bf16 %v8129_v12, %v8119_v11 }
 0x1d1   : > { %v7278_v6 = vpop.eup %7277  ;;  %v1542_v15 = vadd.f32 1.0, %v7276_v46 }
 0x1d2   : > { %1596 = vrot.lane.b32.xlu1 %v8112_v57, %s7389_s7  ;;  %1598 = vrot.lane.b32.xlu0 %v8114_v4, %s7389_s7  ;;  %v7280_v56 = vpop.eup %7279  ;;  %v1545_v29 = vadd.f32 1.0, %v7278_v6 }
 0x1d3   : > { %7291 = vrcp.f32 %v1542_v15  ;;  %v7282_v30 = vpop.eup %7281  ;;  %v1544_v22 = vadd.f32 1.0, %v7280_v56 }
 0x1d4   : > { %v8150_v37 = vmul.f32 %v7282_v30, %v1483_v13 }
 0x1d5   : > { %v7284_v36 = vpop.eup %7283  ;;  %7293 = vrcp.f32 %v1544_v22 }
 0x1d6   : > { %1600 = vrot.lane.b32.xlu1 %v8133_v53, %s7389_s7  ;;  %v8142_v39 = vmul.f32 %v7284_v36, %v1482_v58  ;;  %7295 = vrcp.f32 %v1545_v29  ;;  %v7286_v60 = vpop.eup %7285  ;;  %9352 = vst [vmem:[#allocation3_spill] sm:$0xff] %v8150_v37 }
 0x1d7   : > { %v8162_v2 = vmul.f32 %v7286_v60, %v1485_v24 }
 0x1d8   : > { %9351 = vst [vmem:[#allocation8_spill] sm:$0xff] %v8142_v39  ;;  %1602 = vrot.lane.b32.xlu0 %v8142_v39, %s7389_s7 }
 0x1d9   : > { %v7288_v55 = vpop.eup %7287  ;;  %9354 = vst [vmem:[#allocation12_spill] sm:$0xff] %v8162_v2 }
 0x1da   : > { %1604 = vrot.lane.b32.xlu1 %v8150_v37, %s7389_s7  ;;  %v8155_v35 = vmul.f32 %v7288_v55, %v1484_v59  ;;  %v7290_v43 = vpop.eup %7289 }
 0x1db   : > { %v8173_v16 = vmul.f32 %v7290_v43, %v1487_v51 }
 0x1dc   : > { %9353 = vst [vmem:[#allocation10_spill] sm:$0xff] %v8155_v35  ;;  %1606 = vrot.lane.b32.xlu0 %v8155_v35, %s7389_s7 }
 0x1dd   : > { %v7292_v5 = vpop.eup %7291  ;;  %9356 = vst [vmem:[#allocation13_spill] sm:$0xff] %v8173_v16 }
 0x1de   : > { %1608 = vrot.lane.b32.xlu1 %v8162_v2, %s7389_s7  ;;  %v8168_v33 = vmul.f32 %v7292_v5, %v1486_v49 }
 0x1df   : > { %v7294_v61 = vpop.eup %7293 }
 0x1e0   : > { %9355 = vst [vmem:[#allocation4_spill] sm:$0xff] %v8168_v33  ;;  %1610 = vrot.lane.b32.xlu0 %v8168_v33, %s7389_s7  ;;  %v7296_v19 = vpop.eup %7295  ;;  %v8175_v20 = vmul.f32 %v7294_v61, %v1488_v17 }
 0x1e1   : > { %v8182_v23 = vmul.f32 %v7296_v19, %v1489_v1 }
 0x1e2   : > { %9357 = vst [vmem:[#allocation14_spill] sm:$0xff] %v8175_v20  ;;  %1612 = vrot.lane.b32.xlu1 %v8173_v16, %s7389_s7 }
 0x1e3   : > { %9358 = vst [vmem:[#allocation5_spill] sm:$0xff] %v8182_v23 }
 0x1e4   : > { %1614 = vrot.lane.b32.xlu0 %v8175_v20, %s7389_s7 }
 0x1e6   : > { %1616 = vrot.lane.b32.xlu1 %v8182_v23, %s7389_s7 }
 0x23c   : > { %v1591_v27 = vpop.permute.xlu0 %1590 }
 0x23d   : > { %v1619_v32 = vsel %vm1618_vm0, %v1591_v27, 0 }
 0x23e   : > { %v8191_v46 = vand.u32 4294901760, %v1619_v32 }
 0x240   : > { %v8194_v6 = vsub.f32 %v1619_v32, %v8191_v46  ;;  %v1593_v15 = vpop.permute.xlu0 %1592  ;;  %v1595_v18 = vpop.permute.xlu1 %1594 }
 0x241   : > { %v1621_v56 = vsel %vm1618_vm0, %v1593_v15, 0  ;;  %v1623_v29 = vsel %vm1618_vm0, %v1595_v18, 0 }
 0x242   : > { %v9251_v30 = vand.u32 4294901760, %v8194_v6  ;;  %v8199_v58 = vand.u32 4294901760, %v1621_v56  ;;  %v8201_v22 = vand.u32 4294901760, %v1623_v29 }
 0x244   : > { %v8204_v36 = vsub.f32 %v1621_v56, %v8199_v58  ;;  %v8207_v25 = vsub.f32 %v1623_v29, %v8201_v22  ;;  %6174 = vmatprep.mubr.f32.mxu1 %v8201_v22  ;;  %v1597_v13 = vpop.permute.xlu1 %1596  ;;  %v1599_v44 = vpop.permute.xlu0 %1598  ;;  %v1717_v38 = vsub.f32 %v8194_v6, %v9251_v30 }
 0x245   : > { %v1625_v60 = vsel %vm1618_vm0, %v1597_v13, 0  ;;  %v1627_v59 = vsel %vm1618_vm0, %v1599_v44, 0 }
 0x246   : > { %v9250_v34 = vand.u32 4294901760, %v8204_v36  ;;  %v9249_v55 = vand.u32 4294901760, %v8207_v25  ;;  %v8217_v24 = vand.u32 4294901760, %v1625_v60  ;;  %v8219_v43 = vand.u32 4294901760, %v1627_v59 }
 0x247   : > { %v1718_v49 = vand.u32 4294901760, %v1717_v38 }
 0x248   : > { %v1727_v5 = vsub.f32 %v8204_v36, %v9250_v34  ;;  %v8225_v51 = vsub.f32 %v1625_v60, %v8217_v24  ;;  %v8228_v17 = vsub.f32 %v1627_v59, %v8219_v43  ;;  %6175 = vmatmul.mubr.f32.vlgmr.msra.gmra.mrb[0].mxu1 %v8217_v24  ;;  %v1601_v61 = vpop.permute.xlu1 %1600  ;;  %v1737_v19 = vsub.f32 %v8207_v25, %v9249_v55 }
 0x249   : > { %6046 = vmatprep.mubr.f32.mxu0 %v1718_v49  ;;  %v1629_v1 = vsel %vm1618_vm0, %v1601_v61, 0  ;;  %6177 = vmatprep.mubr.f32.mxu1 %v8219_v43 }
 0x24a   : > { %v1728_v27 = vand.u32 4294901760, %v1727_v5  ;;  %v9248_v32 = vand.u32 4294901760, %v8225_v51  ;;  %v9247_v15 = vand.u32 4294901760, %v8228_v17  ;;  %v8238_v18 = vand.u32 4294901760, %v1629_v1  ;;  %v1603_v56 = vpop.permute.xlu0 %1602 }
 0x24b   : > { %v1631_v29 = vsel %vm1618_vm0, %v1603_v56, 0  ;;  %v1738_v13 = vand.u32 4294901760, %v1737_v19 }
 0x24c   : > { %v8242_v44 = vsub.f32 %v1629_v1, %v8238_v18  ;;  %v8244_v38 = vand.u32 4294901760, %v1631_v29  ;;  %6047 = vmatmul.mubr.f32.vlgmr.msra.gmra.mrb[14].mxu0 %v1728_v27  ;;  %6178 = vmatmul.mubr.f32.gmra.mrb[2].mxu1 %v8238_v18  ;;  %v1605_v60 = vpop.permute.xlu1 %1604  ;;  %v1747_v59 = vsub.f32 %v8225_v51, %v9248_v32  ;;  %v1757_v49 = vsub.f32 %v8228_v17, %v9247_v15 }
 0x24d   : > { %6739 = vmatpush3.bf16.msra.mxu0 %v8157_v7  ;;  %v1633_v5 = vsel %vm1618_vm0, %v1605_v60, 0  ;;  %6049 = vmatprep.mubr.f32.mxu0 %v1738_v13 }
 0x24e   : > { %v9252_v61 = vand.u32 4294901760, %v8242_v44  ;;  %v8257_v19 = vsub.f32 %v1631_v29, %v8244_v38  ;;  %v8259_v1 = vand.u32 4294901760, %v1633_v5  ;;  %v1607_v27 = vpop.permute.xlu0 %1606  ;;  %6180 = vmatprep.mubr.f32.mxu1 %v8244_v38  ;;  %v1748_v56 = vand.u32 4294901760, %v1747_v59  ;;  %6741 = vmatprep.subr.bf16.mxu0 %v8186_v26 }
 0x24f   : > { %v1635_v15 = vsel %vm1618_vm0, %v1607_v27, 0  ;;  %v1758_v32 = vand.u32 4294901760, %v1757_v49 }
 0x250   : > { %v9255_v7 = vand.u32 4294901760, %v8257_v19  ;;  %v8266_v13 = vsub.f32 %v1633_v5, %v8259_v1  ;;  %v8268_v60 = vand.u32 4294901760, %v1635_v15  ;;  %6050 = vmatmul.mubr.f32.gmra.mrb[16].mxu0 %v1748_v56  ;;  %6181 = vmatmul.mubr.f32.gmra.mrb[4].mxu1 %v8259_v1  ;;  %v1609_v29 = vpop.permute.xlu1 %1608  ;;  %v1767_v59 = vsub.f32 %v8242_v44, %v9252_v61 }
 0x251   : > { %v1637_v55 = vsel %vm1618_vm0, %v1609_v29, 0  ;;  %6052 = vmatprep.mubr.f32.mxu0 %v1758_v32 }
 0x252   : > { %v9259_v49 = vand.u32 4294901760, %v8266_v13  ;;  %v8277_v27 = vsub.f32 %v1635_v15, %v8268_v60  ;;  %v8279_v5 = vand.u32 4294901760, %v1637_v55  ;;  %v1611_v34 = vpop.permute.xlu0 %1610  ;;  %6183 = vmatprep.mubr.f32.mxu1 %v8268_v60  ;;  %v1768_v56 = vand.u32 4294901760, %v1767_v59 }
 0x253   : > { %v1639_v30 = vsel %vm1618_vm0, %v1611_v34, 0  ;;  %v1777_v61 = vsub.f32 %v8257_v19, %v9255_v7 }
 0x254   : > { %v8288_v32 = vsub.f32 %v1637_v55, %v8279_v5  ;;  %v8290_v9 = vand.u32 4294901760, %v1639_v30  ;;  %6053 = vmatmul.mubr.f32.gmra.mrb[18].mxu0 %v1768_v56  ;;  %6184 = vmatmul.mubr.f32.gmra.mrb[6].mxu1 %v8279_v5  ;;  %v1613_v15 = vpop.permute.xlu1 %1612  ;;  %v1787_v59 = vsub.f32 %v8266_v13, %v9259_v49  ;;  %v9359_v16 = vand.u32 4294901760, %v8277_v27 }
 0x255   : > { %v1641_v34 = vsel %vm1618_vm0, %v1613_v15, 0  ;;  %v1778_v10 = vand.u32 4294901760, %v1777_v61 }
 0x256   : > { %v8299_v29 = vsub.f32 %v1639_v30, %v8290_v9  ;;  %v8301_v55 = vand.u32 4294901760, %v1641_v34  ;;  %v1615_v23 = vpop.permute.xlu0 %1614  ;;  %6186 = vmatprep.mubr.f32.mxu1 %v8290_v9  ;;  %v1788_v56 = vand.u32 4294901760, %v1787_v59  ;;  %v1797_v49 = vsub.f32 %v8277_v27, %v9359_v16 }
 0x257   : > { %v1643_v20 = vsel %vm1618_vm0, %v1615_v23, 0  ;;  %6055 = vmatprep.mubr.f32.mxu0 %v1778_v10  ;;  %v9360_v59 = vand.u32 4294901760, %v8288_v32 }
 0x258   : > { %v8310_v15 = vsub.f32 %v1641_v34, %v8301_v55  ;;  %v8312_v30 = vand.u32 4294901760, %v1643_v20  ;;  %6056 = vmatmul.mubr.f32.gmra.mrb[20].mxu0 %v1788_v56  ;;  %6187 = vmatmul.mubr.f32.gmra.mrb[8].mxu1 %v8301_v55  ;;  %v1617_v7 = vpop.permute.xlu1 %1616  ;;  %v1798_v33 = vand.u32 4294901760, %v1797_v49  ;;  %v9361_v2 = vand.u32 4294901760, %v8299_v29 }
 0x259   : > { %v1807_v23 = vsub.f32 %v8288_v32, %v9360_v59  ;;  %v1645_v10 = vsel %vm1618_vm0, %v1617_v7, 0 }
 0x25a   : > { %v1826_v16 = vand.u32 4294901760, %v8310_v15  ;;  %v8321_v61 = vsub.f32 %v1643_v20, %v8312_v30  ;;  %v8323_v34 = vand.u32 4294901760, %v1645_v10  ;;  %6189 = vmatprep.mubr.f32.mxu1 %v8312_v30  ;;  %6058 = vmatprep.mubr.f32.mxu0 %v1798_v33  ;;  %v1817_v35 = vsub.f32 %v8299_v29, %v9361_v2 }
 0x25b   : > { %v1808_v56 = vand.u32 4294901760, %v1807_v23 }
 0x25c   : > { %v1836_v59 = vand.u32 4294901760, %v8321_v61  ;;  %v8331_v7 = vsub.f32 %v1645_v10, %v8323_v34  ;;  %6190 = vmatmul.mubr.f32.gmra.mrb[10].mxu1 %v8323_v34  ;;  %v1827_v20 = vsub.f32 %v8310_v15, %v1826_v16  ;;  %v1818_v49 = vand.u32 4294901760, %v1817_v35 }
 0x25d   : > { %6059 = vmatmul.mubr.f32.gmra.mrb[22].mxu0 %v1808_v56  ;;  %v9367_v56 = vand.u32 4294901760, %v8225_v51 }
 0x25e   : > { %v1846_v23 = vand.u32 4294901760, %v8331_v7  ;;  %v1828_v33 = vand.u32 4294901760, %v1827_v20  ;;  %v1837_v37 = vsub.f32 %v8321_v61, %v1836_v59  ;;  %6061 = vmatprep.mubr.f32.mxu0 %v1818_v49  ;;  %v9368_v20 = vand.u32 4294901760, %v8228_v17 }
 0x260   : > { %v1838_v2 = vand.u32 4294901760, %v1837_v37  ;;  %v1847_v39 = vsub.f32 %v8331_v7, %v1846_v23  ;;  %v9363_v37 = vand.u32 4294901760, %v8129_v12  ;;  %v9365_v12 = vand.u32 4294901760, %v8204_v36 }
 0x261   : > { %6062 = vmatmul.mubr.f32.gmra.mrb[24].mxu0 %v1828_v33 }
 0x262   : > { %6064 = vmatprep.mubr.f32.mxu0 %v1838_v2  ;;  %v1848_v10 = vand.u32 4294901760, %v1847_v39  ;;  %v9362_v39 = vand.u32 4294901760, %v8119_v11  ;;  %v9364_v11 = vand.u32 4294901760, %v8194_v6 }
 0x264   : > { %v6748_v35 = vpack.c.bf16 %v9363_v37, %v9362_v39 }
 0x265   : > { %6065 = vmatmul.mubr.f32.gmra.mrb[26].mxu0 %v1848_v10 }
 0x266   : > { %6071 = vmatprep.mubr.f32.mxu0 %v8191_v46 }
 0x269   : > { %6072 = vmatmul.mubr.f32.vlgmr.msra.gmra.mrb[14].mxu0 %v8199_v58 }
 0x26a   : > { %6743 = vmatpush3.bf16.msra.mxu0 %v8186_v26  ;;  %6074 = vmatprep.mubr.f32.mxu0 %v8201_v22  ;;  %v9366_v26 = vand.u32 4294901760, %v8207_v25 }
 0x26b   : > { %6745 = vmatprep.subr.bf16.mxu0 %v8047_v28 }
 0x26d   : > { %6075 = vmatmul.mubr.f32.gmra.mrb[16].mxu0 %v8217_v24 }
 0x26e   : > { %6077 = vmatprep.mubr.f32.mxu0 %v8219_v43 }
 0x271   : > { %6078 = vmatmul.mubr.f32.gmra.mrb[18].mxu0 %v8238_v18 }
 0x272   : > { %6080 = vmatprep.mubr.f32.mxu0 %v8244_v38 }
 0x275   : > { %6081 = vmatmul.mubr.f32.gmra.mrb[20].mxu0 %v8259_v1 }
 0x276   : > { %6083 = vmatprep.mubr.f32.mxu0 %v8268_v60 }
 0x279   : > { %6084 = vmatmul.mubr.f32.gmra.mrb[22].mxu0 %v8279_v5 }
 0x27a   : > { %6086 = vmatprep.mubr.f32.mxu0 %v8290_v9 }
 0x27d   : > { %6087 = vmatmul.mubr.f32.gmra.mrb[24].mxu0 %v8301_v55 }
 0x27e   : > { %6089 = vmatprep.mubr.f32.mxu0 %v8312_v30 }
 0x281   : > { %6090 = vmatmul.mubr.f32.gmra.mrb[26].mxu0 %v8323_v34 }
 0x282   : > { %6096 = vmatprep.mubr.f32.mxu0 %v8194_v6  ;;  %v9370_v6 = vand.u32 4294901760, %v8257_v19 }
 0x285   : > { %6097 = vmatmul.mubr.f32.vlgmr.msra.gmra.mrb[14].mxu0 %v8204_v36  ;;  %v9371_v36 = vand.u32 4294901760, %v8266_v13 }
 0x286   : > { %6747 = vmatpush3.bf16.msra.mxu0 %v8047_v28  ;;  %6099 = vmatprep.mubr.f32.mxu0 %v8207_v25  ;;  %v9372_v25 = vand.u32 4294901760, %v8277_v27 }
 0x287   : > { %6749 = vmatprep.subr.bf16.mxu0 %v6748_v35 }
 0x289   : > { %6100 = vmatmul.mubr.f32.gmra.mrb[16].mxu0 %v8225_v51  ;;  %v9374_v51 = vand.u32 4294901760, %v8299_v29 }
 0x28a   : > { %6102 = vmatprep.mubr.f32.mxu0 %v8228_v17 }
 0x28d   : > { %6103 = vmatmul.mubr.f32.gmra.mrb[18].mxu0 %v8242_v44 }
 0x28e   : > { %6105 = vmatprep.mubr.f32.mxu0 %v8257_v19 }
 0x291   : > { %6106 = vmatmul.mubr.f32.gmra.mrb[20].mxu0 %v8266_v13 }
 0x292   : > { %6108 = vmatprep.mubr.f32.mxu0 %v8277_v27 }
 0x295   : > { %6109 = vmatmul.mubr.f32.gmra.mrb[22].mxu0 %v8288_v32 }
 0x296   : > { %6111 = vmatprep.mubr.f32.mxu0 %v8299_v29 }
 0x299   : > { %6112 = vmatmul.mubr.f32.gmra.mrb[24].mxu0 %v8310_v15 }
 0x29a   : > { %6114 = vmatprep.mubr.f32.mxu0 %v8321_v61  ;;  %v9369_v61 = vand.u32 4294901760, %v8242_v44 }
 0x29d   : > { %6115 = vmatmul.mubr.f32.gmra.mrb[26].mxu0 %v8331_v7  ;;  %v9373_v7 = vand.u32 4294901760, %v8288_v32 }
 0x29e   : > { %6121 = vmatprep.mubr.f32.mxu0 %v9364_v11 }
 0x2a1   : > { %6122 = vmatmul.mubr.f32.vlgmr.msra.gmra.mrb[14].mxu0 %v9365_v12 }
 0x2a2   : > { %6751 = vmatpush3.bf16.msra.mxu0 %v6748_v35  ;;  %6124 = vmatprep.mubr.f32.mxu0 %v9366_v26 }
 0x2a3   : > { %6753 = vmatprep.subr.bf16.mxu0 %v8047_v28 }
 0x2a5   : > { %6125 = vmatmul.mubr.f32.gmra.mrb[16].mxu0 %v9367_v56 }
 0x2a6   : > { %6127 = vmatprep.mubr.f32.mxu0 %v9368_v20 }
 0x2a9   : > { %6128 = vmatmul.mubr.f32.gmra.mrb[18].mxu0 %v9369_v61  ;;  %v2737_v61 = vld [vmem:[%s9193_s4] sm:$0xff] }
 0x2aa   : > { %6130 = vmatprep.mubr.f32.mxu0 %v9370_v6  ;;  %v2738_v6 = vld [vmem:[%s9193_s4 + $0x8] sm:$0xff] }
 0x2ad   : > { %6131 = vmatmul.mubr.f32.gmra.mrb[20].mxu0 %v9371_v36  ;;  %v8426_v36 = vld [vmem:[%s9193_s4 + $0x10] sm:$0xff] }
 0x2ae   : > { %6133 = vmatprep.mubr.f32.mxu0 %v9372_v25  ;;  %v2815_v25 = vand.u32 4294901760, %v2737_v61 }
 0x2b1   : > { %6134 = vmatmul.mubr.f32.gmra.mrb[22].mxu0 %v9373_v7  ;;  %v2818_v7 = vand.u32 4294901760, %v2738_v6 }
 0x2b2   : > { %6136 = vmatprep.mubr.f32.mxu0 %v9374_v51  ;;  %v8431_v51 = vld [vmem:[%s9193_s4 + $0x18] sm:$0xff] }
 0x2b5   : > { %6137 = vmatmul.mubr.f32.gmra.mrb[24].mxu0 %v1826_v16 }
 0x2b6   : > { %6139 = vmatprep.mubr.f32.mxu0 %v1836_v59 }
 0x2b9   : > { %6140 = vmatmul.mubr.f32.gmra.mrb[26].mxu0 %v1846_v23 }
 0x2ba   : > { %6146 = vmatprep.mubr.f32.mxu0 %v8191_v46 }
 0x2bd   : > { %6147 = vmatmul.mubr.f32.vlgmr.msra.gmra.mrb[14].mxu0 %v8199_v58 }
 0x2be   : > { %6755 = vmatpush3.bf16.msra.mxu0 %v8047_v28  ;;  %6149 = vmatprep.mubr.f32.mxu0 %v8201_v22 }
 0x2c1   : > { %6150 = vmatmul.mubr.f32.gmra.mrb[16].mxu0 %v8217_v24 }
 0x2c2   : > { %6152 = vmatprep.mubr.f32.mxu0 %v8219_v43 }
 0x2c5   : > { %6153 = vmatmul.mubr.f32.gmra.mrb[18].mxu0 %v8238_v18 }
 0x2c6   : > { %6155 = vmatprep.mubr.f32.mxu0 %v8244_v38 }
 0x2c9   : > { %6156 = vmatmul.mubr.f32.gmra.mrb[20].mxu0 %v8259_v1 }
 0x2ca   : > { %6158 = vmatprep.mubr.f32.mxu0 %v8268_v60 }
 0x2cd   : > { %6159 = vmatmul.mubr.f32.gmra.mrb[22].mxu0 %v8279_v5 }
 0x2ce   : > { %6161 = vmatprep.mubr.f32.mxu0 %v8290_v9 }
 0x2d1   : > { %6162 = vmatmul.mubr.f32.gmra.mrb[24].mxu0 %v8301_v55 }
 0x2d2   : > { %6164 = vmatprep.mubr.f32.mxu0 %v8312_v30 }
 0x2d5   : > { %6165 = vmatmul.mubr.f32.gmra.mrb[26].mxu0 %v8323_v34 }
 0x2d6   : > { %6171 = vmatprep.mubr.f32.mxu0 %v8191_v46 }
 0x2d9   : > { %6172 = vmatmul.mubr.f32.vlgmr.msra.gmra.mrb[14].mxu0 %v8199_v58 }
 0x31b   : > { %v6176_v28 = vpop.f32.mrb[0].mxu1 }
 0x31c   : > { %v2595_v22 = vpop.f32.mrb[1].mxu1 }
 0x31f   : > { %v6179_v24 = vpop.f32.mrb[2].mxu1 }
 0x320   : > { %v2607_v43 = vpop.f32.mrb[3].mxu1 }
 0x323   : > { %v6182_v17 = vpop.f32.mrb[4].mxu1 }
 0x324   : > { %v2619_v18 = vpop.f32.mrb[5].mxu1 }
 0x327   : > { %v6185_v44 = vpop.f32.mrb[6].mxu1 }
 0x328   : > { %v2631_v38 = vpop.f32.mrb[7].mxu1 }
 0x32b   : > { %v6188_v19 = vpop.f32.mrb[8].mxu1 }
 0x32c   : > { %v2643_v9 = vpop.f32.mrb[9].mxu1 }
 0x32f   : > { %v6191_v1 = vpop.f32.mrb[10].mxu1 }
 0x330   : > { %v2655_v13 = vpop.f32.mrb[11].mxu1 }
 0x394   : > { %v6151_v60 = vpop.f32.mrb[16].mxu0 }
 0x395   : > { %v6854_v27 = vadd.f32 %v6176_v28, %v6151_v60  ;;  %v2444_v5 = vpop.f32.mrb[17].mxu0  ;;  %v2821_v28 = vand.u32 4294901760, %v8426_v36 }
 0x396   : > { %v6855_v29 = vadd.f32 %v2595_v22, %v2444_v5  ;;  %v2824_v22 = vand.u32 4294901760, %v8431_v51 }
 0x398   : > { %v6154_v32 = vpop.f32.mrb[18].mxu0 }
 0x399   : > { %v6856_v46 = vadd.f32 %v6179_v24, %v6154_v32  ;;  %v2456_v55 = vpop.f32.mrb[19].mxu0  ;;  %v8435_v24 = vpack.c.bf16 %v2818_v7, %v2815_v25 }
 0x39a   : > { %v6857_v58 = vadd.f32 %v2607_v43, %v2456_v55  ;;  %v8441_v43 = vpack.c.bf16 %v2824_v22, %v2821_v28 }
 0x39b   : > { %6757 = vmatprep.subr.bf16.mxu1 %v8435_v24 }
 0x39c   : > { %v6157_v15 = vpop.f32.mrb[20].mxu0  ;;  %6759 = vmatpush3.bf16.msra.mxu1 %v8435_v24 }
 0x39d   : > { %v6858_v30 = vadd.f32 %v6182_v17, %v6157_v15  ;;  %v2468_v16 = vpop.f32.mrb[21].mxu0  ;;  %6761 = vmatprep.subr.bf16.mxu1 %v8441_v43  ;;  %v2741_v17 = vld [vmem:[%s9193_s4 + $0x20] sm:$0xff] }
 0x39e   : > { %v6859_v34 = vadd.f32 %v2619_v18, %v2468_v16  ;;  %v2742_v18 = vld [vmem:[%s9193_s4 + $0x28] sm:$0xff] }
 0x3a0   : > { %v6160_v59 = vpop.f32.mrb[22].mxu0  ;;  %6763 = vmatpush3.bf16.msra.mxu1 %v8441_v43 }
 0x3a1   : > { %v6860_v49 = vadd.f32 %v6185_v44, %v6160_v59  ;;  %v2480_v23 = vpop.f32.mrb[23].mxu0  ;;  %v2827_v44 = vand.u32 4294901760, %v2741_v17 }
 0x3a2   : > { %v6861_v33 = vadd.f32 %v2631_v38, %v2480_v23  ;;  %v2830_v38 = vand.u32 4294901760, %v2742_v18 }
 0x3a4   : > { %v6163_v2 = vpop.f32.mrb[24].mxu0 }
 0x3a5   : > { %v6862_v10 = vadd.f32 %v6188_v19, %v6163_v2  ;;  %v2492_v39 = vpop.f32.mrb[25].mxu0 }
 0x3a6   : > { %v6863_v37 = vadd.f32 %v2643_v9, %v2492_v39  ;;  %v8453_v9 = vpack.c.bf16 %v2830_v38, %v2827_v44 }
 0x3a8   : > { %v6166_v35 = vpop.f32.mrb[26].mxu0  ;;  %6765 = vmatprep.subr.bf16.mxu1 %v8453_v9 }
 0x3a9   : > { %v6864_v11 = vadd.f32 %v6191_v1, %v6166_v35  ;;  %v2504_v12 = vpop.f32.mrb[27].mxu0  ;;  %6767 = vmatpush3.bf16.msra.mxu1 %v8453_v9  ;;  %v8494_v35 = vsub.f32 %v2742_v18, %v2830_v38 }
 0x3aa   : > { %v6865_v26 = vadd.f32 %v2655_v13, %v2504_v12 }
 0x3ac   : > { %v6173_v56 = vpop.f32.mrb[14].mxu0 }
 0x3ad   : > { %2681 = vrot.lane.b32.xlu1 %v6173_v56, %s7390_s9  ;;  %v2583_v20 = vpop.f32.mrb[15].mxu0 }
 0x3ae   : > { %2679 = vrot.lane.b32.xlu0 %v2583_v20, %s7390_s9 }
 0x3b1   : > { %2685 = vrot.lane.b32.xlu1 %v6854_v27, %s7390_s9 }
 0x3b2   : > { %2683 = vrot.lane.b32.xlu0 %v6855_v29, %s7390_s9 }
 0x3b5   : > { %2689 = vrot.lane.b32.xlu1 %v6856_v46, %s7390_s9 }
 0x3b6   : > { %2687 = vrot.lane.b32.xlu0 %v6857_v58, %s7390_s9 }
 0x3b9   : > { %2693 = vrot.lane.b32.xlu1 %v6858_v30, %s7390_s9 }
 0x3ba   : > { %2691 = vrot.lane.b32.xlu0 %v6859_v34, %s7390_s9 }
 0x3bd   : > { %2697 = vrot.lane.b32.xlu1 %v6860_v49, %s7390_s9 }
 0x3be   : > { %2695 = vrot.lane.b32.xlu0 %v6861_v33, %s7390_s9 }
 0x3c1   : > { %2701 = vrot.lane.b32.xlu1 %v6862_v10, %s7390_s9 }
 0x3c2   : > { %2699 = vrot.lane.b32.xlu0 %v6863_v37, %s7390_s9 }
 0x3c5   : > { %2705 = vrot.lane.b32.xlu1 %v6864_v11, %s7390_s9 }
 0x3c6   : > { %2703 = vrot.lane.b32.xlu0 %v6865_v26, %s7390_s9  ;;  %s224_s9 = sand.u32 1, %s7347_s18   ;;  %s4953_s18 = ssub.s32 (%p7447_p4), 25, %s7461_s8 }
 0x3c7   : > { %s7148_s10 = smul.u32 112, %s224_s9  ;;  %p4954_p8 = scmp.lt.s32.totalorder (%p7447_p4), %s4953_s18, 14 }
 0x3c9   : > { %s9068_s11 = scalar_lea.vmem [#allocation2], %s7148_s10  }
 0x41f   : > { %v2682_v19 = vpop.permute.xlu1 %2681 }
 0x420   : > { %v2722_v1 = vmul.f32 %v8053_v42, %v2682_v19  ;;  %v2680_v13 = vpop.permute.xlu0 %2679  ;;  %v8464_v42 = vsub.f32 %v2737_v61, %v2815_v25 }
 0x421   : > { %v2721_v60 = vmul.f32 %v2680_v13, %v8056_v45  ;;  %v8466_v45 = vsub.f32 %v2738_v6, %v2818_v7 }
 0x422   : > { %2759 = vrot.lane.b32.xlu1 %v2722_v1, %s7391_s28  ;;  %v3028_v15 = vand.u32 4294901760, %v8464_v42 }
 0x423   : > { %v2686_v27 = vpop.permute.xlu1 %2685  ;;  %2757 = vrot.lane.b32.xlu0 %v2721_v60, %s7391_s28  ;;  %v3035_v30 = vand.u32 4294901760, %v8466_v45 }
 0x424   : > { %v2724_v5 = vmul.f32 %v8059_v3, %v2686_v27  ;;  %v2684_v29 = vpop.permute.xlu0 %2683 }
 0x425   : > { %v2723_v32 = vmul.f32 %v2684_v29, %v8062_v0  ;;  %v3029_v0 = vsub.f32 %v8464_v42, %v3028_v15  ;;  %v3036_v16 = vsub.f32 %v8466_v45, %v3035_v30 }
 0x426   : > { %2763 = vrot.lane.b32.xlu1 %v2724_v5, %s7391_s28 }
 0x427   : > { %v2690_v46 = vpop.permute.xlu1 %2689  ;;  %2761 = vrot.lane.b32.xlu0 %v2723_v32, %s7391_s28  ;;  %v3030_v49 = vand.u32 4294901760, %v3029_v0  ;;  %v3037_v23 = vand.u32 4294901760, %v3036_v16 }
 0x428   : > { %v2726_v55 = vmul.f32 %v8065_v52, %v2690_v46  ;;  %v2688_v58 = vpop.permute.xlu0 %2687 }
 0x429   : > { %v2725_v3 = vmul.f32 %v2688_v58, %v8068_v50  ;;  %v8484_v33 = vpack.c.bf16 %v3037_v23, %v3030_v49 }
 0x42a   : > { %2767 = vrot.lane.b32.xlu1 %v2726_v55, %s7391_s28 }
 0x42b   : > { %v2694_v34 = vpop.permute.xlu1 %2693  ;;  %2765 = vrot.lane.b32.xlu0 %v2725_v3, %s7391_s28  ;;  %6769 = vmatprep.subr.bf16.mxu1 %v8484_v33 }
 0x42c   : > { %v2728_v52 = vmul.f32 %v8071_v31, %v2694_v34  ;;  %v2692_v59 = vpop.permute.xlu0 %2691 }
 0x42d   : > { %v2727_v50 = vmul.f32 %v2692_v59, %v8074_v63  ;;  %v8492_v63 = vsub.f32 %v2741_v17, %v2827_v44  ;;  %v8514_v17 = vpack.c.bf16 %v8466_v45, %v8464_v42  ;;  %v8530_v44 = vsub.f32 %v8431_v51, %v2824_v22 }
 0x42e   : > { %2771 = vrot.lane.b32.xlu1 %v2728_v52, %s7391_s28 }
 0x42f   : > { %v2698_v2 = vpop.permute.xlu1 %2697  ;;  %2769 = vrot.lane.b32.xlu0 %v2727_v50, %s7391_s28  ;;  %v3049_v1 = vand.u32 4294901760, %v8530_v44  ;;  %v9375_v45 = vand.u32 4294901760, %v8492_v63 }
 0x430   : > { %v2730_v10 = vmul.f32 %v8077_v40, %v2698_v2  ;;  %v2696_v39 = vpop.permute.xlu0 %2695  ;;  %v9273_v40 = vand.u32 4294901760, %v8492_v63 }
 0x431   : > { %v2729_v37 = vmul.f32 %v2696_v39, %v8080_v62  ;;  %v9272_v62 = vand.u32 4294901760, %v8494_v35  ;;  %v3050_v29 = vsub.f32 %v8530_v44, %v3049_v1 }
 0x432   : > { %2775 = vrot.lane.b32.xlu1 %v2730_v10, %s7391_s28  ;;  %v3057_v20 = vsub.f32 %v8492_v63, %v9273_v40 }
 0x433   : > { %v2702_v31 = vpop.permute.xlu1 %2701  ;;  %2773 = vrot.lane.b32.xlu0 %v2729_v37, %s7391_s28  ;;  %v3051_v50 = vand.u32 4294901760, %v3050_v29 }
 0x434   : > { %v2732_v11 = vmul.f32 %v8083_v21, %v2702_v31  ;;  %v2700_v12 = vpop.permute.xlu0 %2699  ;;  %v3064_v21 = vsub.f32 %v8494_v35, %v9272_v62  ;;  %v3058_v25 = vand.u32 4294901760, %v3057_v20 }
 0x435   : > { %v2731_v26 = vmul.f32 %v2700_v12, %v8086_v14 }
 0x436   : > { %2779 = vrot.lane.b32.xlu1 %v2732_v11, %s7391_s28  ;;  %v3065_v7 = vand.u32 4294901760, %v3064_v21 }
 0x437   : > { %v2706_v56 = vpop.permute.xlu1 %2705  ;;  %2777 = vrot.lane.b32.xlu0 %v2731_v26, %s7391_s28 }
 0x438   : > { %v2734_v61 = vmul.f32 %v8089_v54, %v2706_v56  ;;  %v2704_v6 = vpop.permute.xlu0 %2703  ;;  %v8516_v18 = vpack.c.bf16 %v3065_v7, %v3058_v25  ;;  %v8520_v54 = vpack.c.bf16 %v8494_v35, %v8492_v63 }
 0x439   : > { %v2733_v14 = vmul.f32 %v2704_v6, %v8092_v41  ;;  %v8525_v41 = vsub.f32 %v8426_v36, %v2821_v28 }
 0x43a   : > { %2783 = vrot.lane.b32.xlu1 %v2734_v61, %s7391_s28 }
 0x43b   : > { %2781 = vrot.lane.b32.xlu0 %v2733_v14, %s7391_s28  ;;  %v3042_v19 = vand.u32 4294901760, %v8525_v41 }
 0x43d   : > { %v3043_v22 = vsub.f32 %v8525_v41, %v3042_v19  ;;  %v6808_v42 = vpack.c.bf16 %v3049_v1, %v3042_v19 }
 0x43f   : > { %v3044_v23 = vand.u32 4294901760, %v3043_v22 }
 0x441   : > { %v6772_v25 = vpack.c.bf16 %v3051_v50, %v3044_v23 }
 0x494   : > { %v2760_v38 = vpop.permute.xlu1 %2759 }
 0x495   : > { %v2788_v13 = vsel %vm2785_vm1, %v2760_v38, 0  ;;  %v2758_v60 = vpop.permute.xlu0 %2757 }
 0x496   : > { %v8535_v27 = vand.u32 4294901760, %v2788_v13  ;;  %v2786_v5 = vsel %vm2785_vm1, %v2758_v60, 0 }
 0x497   : > { %v8538_v36 = vand.u32 4294901760, %v2786_v5 }
 0x498   : > { %v8541_v28 = vsub.f32 %v2788_v13, %v8535_v27  ;;  %v2764_v51 = vpop.permute.xlu1 %2763 }
 0x499   : > { %v8550_v32 = vsub.f32 %v2786_v5, %v8538_v36  ;;  %v2792_v46 = vsel %vm2785_vm1, %v2764_v51, 0  ;;  %v2762_v55 = vpop.permute.xlu0 %2761 }
 0x49a   : > { %v2897_v58 = vand.u32 4294901760, %v8541_v28  ;;  %v8554_v3 = vand.u32 4294901760, %v2792_v46  ;;  %v2790_v0 = vsel %vm2785_vm1, %v2762_v55, 0 }
 0x49b   : > { %v2887_v16 = vand.u32 4294901760, %v8550_v32  ;;  %v8558_v34 = vand.u32 4294901760, %v2790_v0 }
 0x49c   : > { %v2898_v52 = vsub.f32 %v8541_v28, %v2897_v58  ;;  %v8564_v59 = vsub.f32 %v2792_v46, %v8554_v3  ;;  %v2768_v49 = vpop.permute.xlu1 %2767 }
 0x49d   : > { %v8567_v2 = vsub.f32 %v2790_v0, %v8558_v34  ;;  %v2796_v10 = vsel %vm2785_vm1, %v2768_v49, 0  ;;  %v2766_v39 = vpop.permute.xlu0 %2765  ;;  %v2888_v37 = vsub.f32 %v8550_v32, %v2887_v16 }
 0x49e   : > { %v9270_v31 = vand.u32 4294901760, %v8564_v59  ;;  %v8574_v11 = vand.u32 4294901760, %v2796_v10  ;;  %v2794_v12 = vsel %vm2785_vm1, %v2766_v39, 0  ;;  %v2899_v61 = vand.u32 4294901760, %v2898_v52 }
 0x49f   : > { %v2907_v26 = vand.u32 4294901760, %v8567_v2  ;;  %v8578_v56 = vand.u32 4294901760, %v2794_v12  ;;  %v2889_v20 = vand.u32 4294901760, %v2888_v37 }
 0x4a0   : > { %v8581_v6 = vsub.f32 %v2796_v10, %v8574_v11  ;;  %v2772_v21 = vpop.permute.xlu1 %2771  ;;  %v2918_v14 = vsub.f32 %v8564_v59, %v9270_v31 }
 0x4a1   : > { %v8587_v7 = vsub.f32 %v2794_v12, %v8578_v56  ;;  %v2800_v38 = vsel %vm2785_vm1, %v2772_v21, 0  ;;  %6204 = vmatprep.mubr.f32.mxu1 %v2889_v20  ;;  %v2770_v13 = vpop.permute.xlu0 %2769  ;;  %v2908_v60 = vsub.f32 %v8567_v2, %v2907_v26 }
 0x4a2   : > { %v9266_v5 = vand.u32 4294901760, %v8581_v6  ;;  %v8594_v51 = vand.u32 4294901760, %v2800_v38  ;;  %v2798_v22 = vsel %vm2785_vm1, %v2770_v13, 0  ;;  %6205 = vmatmul.mubr.f32.vlgmr.msra.gmra.mrb[12].mxu1 %v2899_v61  ;;  %v2919_v49 = vand.u32 4294901760, %v2918_v14 }
 0x4a3   : > { %v9268_v29 = vand.u32 4294901760, %v8587_v7  ;;  %v8598_v46 = vand.u32 4294901760, %v2798_v22  ;;  %6771 = vmatpush3.bf16.msra.mxu1 %v8484_v33  ;;  %v2909_v55 = vand.u32 4294901760, %v2908_v60 }
 0x4a4   : > { %v8602_v0 = vsub.f32 %v2800_v38, %v8594_v51  ;;  %v2776_v52 = vpop.permute.xlu1 %2775  ;;  %v2938_v23 = vsub.f32 %v8581_v6, %v9266_v5  ;;  %6773 = vmatprep.subr.bf16.mxu1 %v6772_v25 }
 0x4a5   : > { %v8608_v50 = vsub.f32 %v2798_v22, %v8598_v46  ;;  %v2804_v10 = vsel %vm2785_vm1, %v2776_v52, 0  ;;  %6207 = vmatprep.mubr.f32.mxu1 %v2909_v55  ;;  %v2774_v39 = vpop.permute.xlu0 %2773  ;;  %v2928_v33 = vsub.f32 %v8587_v7, %v9268_v29 }
 0x4a6   : > { %v9265_v37 = vand.u32 4294901760, %v8602_v0  ;;  %v8615_v12 = vand.u32 4294901760, %v2804_v10  ;;  %v2802_v20 = vsel %vm2785_vm1, %v2774_v39, 0  ;;  %6208 = vmatmul.mubr.f32.gmra.mrb[14].mxu1 %v2919_v49  ;;  %v2939_v60 = vand.u32 4294901760, %v2938_v23 }
 0x4a7   : > { %v9267_v61 = vand.u32 4294901760, %v8608_v50  ;;  %v8619_v21 = vand.u32 4294901760, %v2802_v20  ;;  %v2929_v14 = vand.u32 4294901760, %v2928_v33  ;;  %6775 = vmatpush3.bf16.msra.mxu1 %v6772_v25  ;;  %v9381_v63 = vand.u32 4294901760, %v8602_v0 }
 0x4a8   : > { %v8622_v38 = vsub.f32 %v2804_v10, %v8615_v12  ;;  %v2780_v13 = vpop.permute.xlu1 %2779  ;;  %v2958_v22 = vsub.f32 %v8602_v0, %v9265_v37  ;;  %6777 = vmatprep.subr.bf16.mxu1 %v8516_v18 }
 0x4a9   : > { %v8629_v55 = vsub.f32 %v2802_v20, %v8619_v21  ;;  %v2808_v52 = vsel %vm2785_vm1, %v2780_v13, 0  ;;  %6210 = vmatprep.mubr.f32.mxu1 %v2929_v14  ;;  %v2778_v49 = vpop.permute.xlu0 %2777  ;;  %v2948_v25 = vsub.f32 %v8608_v50, %v9267_v61 }
 0x4aa   : > { %v9269_v10 = vand.u32 4294901760, %v8622_v38  ;;  %v8636_v23 = vand.u32 4294901760, %v2808_v52  ;;  %v2806_v39 = vsel %vm2785_vm1, %v2778_v49, 0  ;;  %6211 = vmatmul.mubr.f32.gmra.mrb[16].mxu1 %v2939_v60  ;;  %v2959_v5 = vand.u32 4294901760, %v2958_v22 }
 0x4ab   : > { %v9271_v33 = vand.u32 4294901760, %v8629_v55  ;;  %v8640_v37 = vand.u32 4294901760, %v2806_v39  ;;  %v2949_v20 = vand.u32 4294901760, %v2948_v25  ;;  %6779 = vmatpush3.bf16.msra.mxu1 %v8516_v18  ;;  %v9383_v19 = vand.u32 4294901760, %v8622_v38 }
 0x4ac   : > { %v8644_v14 = vsub.f32 %v2808_v52, %v8636_v23  ;;  %v2784_v13 = vpop.permute.xlu1 %2783  ;;  %v2978_v61 = vsub.f32 %v8622_v38, %v9269_v10  ;;  %6781 = vmatprep.subr.bf16.mxu1 %v8514_v17 }
 0x4ad   : > { %v8651_v60 = vsub.f32 %v2806_v39, %v8640_v37  ;;  %v2812_v49 = vsel %vm2785_vm1, %v2784_v13, 0  ;;  %6213 = vmatprep.mubr.f32.mxu1 %v2949_v20  ;;  %v2782_v25 = vpop.permute.xlu0 %2781  ;;  %v2968_v18 = vsub.f32 %v8629_v55, %v9271_v33 }
 0x4ae   : > { %v9274_v52 = vand.u32 4294901760, %v8644_v14  ;;  %v8658_v22 = vand.u32 4294901760, %v2812_v49  ;;  %v2810_v29 = vsel %vm2785_vm1, %v2782_v25, 0  ;;  %6214 = vmatmul.mubr.f32.gmra.mrb[18].mxu1 %v2959_v5  ;;  %v2979_v20 = vand.u32 4294901760, %v2978_v61 }
 0x4af   : > { %v2987_v10 = vand.u32 4294901760, %v8651_v60  ;;  %v8662_v31 = vand.u32 4294901760, %v2810_v29  ;;  %v2969_v39 = vand.u32 4294901760, %v2968_v18  ;;  %v9384_v1 = vand.u32 4294901760, %v8644_v14 }
 0x4b0   : > { %v8665_v13 = vsub.f32 %v2812_v49, %v8658_v22  ;;  %v2998_v33 = vsub.f32 %v8644_v14, %v9274_v52 }
 0x4b1   : > { %v8671_v62 = vsub.f32 %v2810_v29, %v8662_v31  ;;  %6216 = vmatprep.mubr.f32.mxu1 %v2969_v39  ;;  %v2988_v5 = vsub.f32 %v8651_v60, %v2987_v10 }
 0x4b2   : > { %v3017_v25 = vand.u32 4294901760, %v8665_v13  ;;  %6217 = vmatmul.mubr.f32.gmra.mrb[20].mxu1 %v2979_v20  ;;  %v2999_v40 = vand.u32 4294901760, %v2998_v33  ;;  %v6784_v20 = vpack.c.bf16 %v8530_v44, %v8525_v41  ;;  %v9379_v41 = vand.u32 4294901760, %v8581_v6 }
 0x4b3   : > { %v3007_v18 = vand.u32 4294901760, %v8671_v62  ;;  %v2989_v49 = vand.u32 4294901760, %v2988_v5  ;;  %v9380_v44 = vand.u32 4294901760, %v8608_v50 }
 0x4b4   : > { %v3018_v61 = vsub.f32 %v8665_v13, %v3017_v25 }
 0x4b5   : > { %6219 = vmatprep.mubr.f32.mxu1 %v2989_v49  ;;  %v3008_v29 = vsub.f32 %v8671_v62, %v3007_v18 }
 0x4b6   : > { %6220 = vmatmul.mubr.f32.gmra.mrb[22].mxu1 %v2999_v40  ;;  %v3019_v52 = vand.u32 4294901760, %v3018_v61  ;;  %v6804_v40 = vpack.c.bf16 %v3035_v30, %v3028_v15  ;;  %v9376_v15 = vand.u32 4294901760, %v8494_v35  ;;  %v9382_v35 = vand.u32 4294901760, %v8629_v55 }
 0x4b7   : > { %v3009_v39 = vand.u32 4294901760, %v3008_v29 }
 0x4b8   : > { %v6812_v30 = vpack.c.bf16 %v9376_v15, %v9375_v45  ;;  %v9389_v15 = vld [vmem:[#allocation4_spill] sm:$0xff] }
 0x4b9   : > { %6222 = vmatprep.mubr.f32.mxu1 %v3009_v39 }
 0x4ba   : > { %6223 = vmatmul.mubr.f32.gmra.mrb[24].mxu1 %v3019_v52  ;;  %v9386_v52 = vld [vmem:[#allocation3_spill] sm:$0xff] }
 0x4bb   : > { %6237 = vmatprep.mubr.f32.mxu1 %v8538_v36 }
 0x4be   : > { %6238 = vmatmul.mubr.f32.vlgmr.msra.gmra.mrb[12].mxu1 %v8535_v27 }
 0x4bf   : > { %6783 = vmatpush3.bf16.msra.mxu1 %v8514_v17  ;;  %6240 = vmatprep.mubr.f32.mxu1 %v8558_v34  ;;  %v9377_v17 = vand.u32 4294901760, %v8564_v59 }
 0x4c0   : > { %6785 = vmatprep.subr.bf16.mxu1 %v6784_v20 }
 0x4c2   : > { %6241 = vmatmul.mubr.f32.gmra.mrb[14].mxu1 %v8554_v3 }
 0x4c3   : > { %6243 = vmatprep.mubr.f32.mxu1 %v8578_v56  ;;  %6787 = vmatpush3.bf16.msra.mxu1 %v6784_v20 }
 0x4c4   : > { %6789 = vmatprep.subr.bf16.mxu1 %v8520_v54 }
 0x4c6   : > { %6244 = vmatmul.mubr.f32.gmra.mrb[16].mxu1 %v8574_v11 }
 0x4c7   : > { %6246 = vmatprep.mubr.f32.mxu1 %v8598_v46  ;;  %6791 = vmatpush3.bf16.msra.mxu1 %v8520_v54  ;;  %v9378_v54 = vand.u32 4294901760, %v8587_v7 }
 0x4c8   : > { %6793 = vmatprep.subr.bf16.mxu1 %v8435_v24 }
 0x4ca   : > { %6247 = vmatmul.mubr.f32.gmra.mrb[18].mxu1 %v8594_v51 }
 0x4cb   : > { %6249 = vmatprep.mubr.f32.mxu1 %v8619_v21 }
 0x4ce   : > { %6250 = vmatmul.mubr.f32.gmra.mrb[20].mxu1 %v8615_v12 }
 0x4cf   : > { %6252 = vmatprep.mubr.f32.mxu1 %v8640_v37 }
 0x4d2   : > { %6253 = vmatmul.mubr.f32.gmra.mrb[22].mxu1 %v8636_v23 }
 0x4d3   : > { %6255 = vmatprep.mubr.f32.mxu1 %v8662_v31 }
 0x4d6   : > { %6256 = vmatmul.mubr.f32.gmra.mrb[24].mxu1 %v8658_v22 }
 0x4d7   : > { %6270 = vmatprep.mubr.f32.mxu1 %v8550_v32  ;;  %v2736_v32 = vld [vmem:[%s9192_s3 + $0x8] sm:$0xff] }
 0x4da   : > { %6271 = vmatmul.mubr.f32.vlgmr.msra.gmra.mrb[12].mxu1 %v8541_v28  ;;  %v2735_v28 = vld [vmem:[%s9192_s3] sm:$0xff] }
 0x4db   : > { %6795 = vmatpush3.bf16.msra.mxu1 %v8435_v24  ;;  %6273 = vmatprep.mubr.f32.mxu1 %v8567_v2 }
 0x4dc   : > { %6797 = vmatprep.subr.bf16.mxu1 %v8441_v43 }
 0x4de   : > { %6274 = vmatmul.mubr.f32.gmra.mrb[14].mxu1 %v8564_v59 }
 0x4df   : > { %6276 = vmatprep.mubr.f32.mxu1 %v8587_v7  ;;  %6799 = vmatpush3.bf16.msra.mxu1 %v8441_v43 }
 0x4e0   : > { %6801 = vmatprep.subr.bf16.mxu1 %v8453_v9 }
 0x4e2   : > { %6277 = vmatmul.mubr.f32.gmra.mrb[16].mxu1 %v8581_v6 }
 0x4e3   : > { %6279 = vmatprep.mubr.f32.mxu1 %v8608_v50  ;;  %6803 = vmatpush3.bf16.msra.mxu1 %v8453_v9  ;;  %v3884_v50 = vsel %vm1618_vm0, %v8096_v47, 0  ;;  %v3890_v47 = vsel %vm1618_vm0, %v8112_v57, 0 }
 0x4e4   : > { %6805 = vmatprep.subr.bf16.mxu1 %v6804_v40 }
 0x4e6   : > { %6280 = vmatmul.mubr.f32.gmra.mrb[18].mxu1 %v8602_v0 }
 0x4e7   : > { %6282 = vmatprep.mubr.f32.mxu1 %v8629_v55 }
 0x4ea   : > { %6283 = vmatmul.mubr.f32.gmra.mrb[20].mxu1 %v8622_v38  ;;  %v8817_v38 = vand.u32 4294901760, %v3884_v50 }
 0x4eb   : > { %6285 = vmatprep.mubr.f32.mxu1 %v8651_v60 }
 0x4ee   : > { %6286 = vmatmul.mubr.f32.gmra.mrb[22].mxu1 %v8644_v14 }
 0x4ef   : > { %6288 = vmatprep.mubr.f32.mxu1 %v8671_v62  ;;  %v3913_v62 = vand.u32 4294901760, %v2735_v28 }
 0x4f2   : > { %6289 = vmatmul.mubr.f32.gmra.mrb[24].mxu1 %v8665_v13  ;;  %v3898_v13 = vsel %vm1618_vm0, %v9386_v52, 0 }
 0x4f3   : > { %6303 = vmatprep.mubr.f32.mxu1 %v2887_v16  ;;  %v8885_v20 = vand.u32 4294901760, %v3898_v13 }
 0x4f6   : > { %6304 = vmatmul.mubr.f32.vlgmr.msra.gmra.mrb[12].mxu1 %v2897_v58  ;;  %v3916_v58 = vand.u32 4294901760, %v2736_v32 }
 0x4f7   : > { %6807 = vmatpush3.bf16.msra.mxu1 %v6804_v40  ;;  %6306 = vmatprep.mubr.f32.mxu1 %v2907_v26  ;;  %v9388_v40 = vld [vmem:[#allocation12_spill] sm:$0xff] }
 0x4f8   : > { %6809 = vmatprep.subr.bf16.mxu1 %v6808_v42  ;;  %v8779_v16 = vpack.c.bf16 %v3916_v58, %v3913_v62  ;;  %v8787_v59 = vsub.f32 %v2736_v32, %v3916_v58  ;;  %v9390_v32 = vld [vmem:[#allocation13_spill] sm:$0xff] }
 0x4fa   : > { %6307 = vmatmul.mubr.f32.gmra.mrb[14].mxu1 %v9377_v17  ;;  %v4129_v2 = vand.u32 4294901760, %v8787_v59 }
 0x4fb   : > { %6309 = vmatprep.mubr.f32.mxu1 %v9378_v54  ;;  %6811 = vmatpush3.bf16.msra.mxu1 %v6808_v42 }
 0x4fc   : > { %6813 = vmatprep.subr.bf16.mxu1 %v6812_v30  ;;  %v4130_v26 = vsub.f32 %v8787_v59, %v4129_v2 }
 0x4fe   : > { %6310 = vmatmul.mubr.f32.gmra.mrb[16].mxu1 %v9379_v41  ;;  %v4131_v7 = vand.u32 4294901760, %v4130_v26 }
 0x4ff   : > { %6312 = vmatprep.mubr.f32.mxu1 %v9380_v44  ;;  %6815 = vmatpush3.bf16.msra.mxu1 %v6812_v30  ;;  %v3904_v30 = vsel %vm1618_vm0, %v9389_v15, 0 }
 0x500   : > { %6817 = vmatprep.subr.bf16.mxu1 %v8435_v24 }
 0x502   : > { %6313 = vmatmul.mubr.f32.gmra.mrb[18].mxu1 %v9381_v63  ;;  %v8906_v63 = vsub.f32 %v3898_v13, %v8885_v20 }
 0x503   : > { %6315 = vmatprep.mubr.f32.mxu1 %v9382_v35 }
 0x506   : > { %6316 = vmatmul.mubr.f32.gmra.mrb[20].mxu1 %v9383_v19 }
 0x507   : > { %6318 = vmatprep.mubr.f32.mxu1 %v2987_v10 }
 0x50a   : > { %6319 = vmatmul.mubr.f32.gmra.mrb[22].mxu1 %v9384_v1 }
 0x50b   : > { %6321 = vmatprep.mubr.f32.mxu1 %v3007_v18 }
 0x50e   : > { %6322 = vmatmul.mubr.f32.gmra.mrb[24].mxu1 %v3017_v25  ;;  %v9387_v25 = vld [vmem:[#allocation10_spill] sm:$0xff] }
 0x50f   : > { %6336 = vmatprep.mubr.f32.mxu1 %v8538_v36  ;;  %v3900_v18 = vsel %vm1618_vm0, %v9387_v25, 0 }
 0x510   : > { %v8889_v42 = vand.u32 4294901760, %v3900_v18 }
 0x512   : > { %6337 = vmatmul.mubr.f32.vlgmr.msra.gmra.mrb[12].mxu1 %v8535_v27  ;;  %v8913_v1 = vsub.f32 %v3900_v18, %v8889_v42 }
 0x513   : > { %6819 = vmatpush3.bf16.msra.mxu1 %v8435_v24  ;;  %6339 = vmatprep.mubr.f32.mxu1 %v8558_v34  ;;  %v8785_v24 = vsub.f32 %v2735_v28, %v3913_v62  ;;  %v8915_v28 = vand.u32 4294901760, %v3904_v30  ;;  %v3906_v62 = vsel %vm1618_vm0, %v9390_v32, 0 }
 0x514   : > { %6821 = vmatprep.subr.bf16.mxu1 %v8441_v43  ;;  %v4061_v52 = vand.u32 4294901760, %v8913_v1 }
 0x516   : > { %6340 = vmatmul.mubr.f32.gmra.mrb[14].mxu1 %v8554_v3 }
 0x517   : > { %6342 = vmatprep.mubr.f32.mxu1 %v8578_v56  ;;  %6823 = vmatpush3.bf16.msra.mxu1 %v8441_v43  ;;  %v4122_v43 = vand.u32 4294901760, %v8785_v24 }
 0x518   : > { %6825 = vmatprep.subr.bf16.mxu1 %v8453_v9 }
 0x51a   : > { %6343 = vmatmul.mubr.f32.gmra.mrb[16].mxu1 %v8574_v11 }
 0x51b   : > { %6345 = vmatprep.mubr.f32.mxu1 %v8598_v46  ;;  %6827 = vmatpush3.bf16.msra.mxu1 %v8453_v9  ;;  %v4123_v9 = vsub.f32 %v8785_v24, %v4122_v43 }
 0x51c   : > { %6829 = vmatprep.subr.bf16.mxu1 %v8779_v16 }
 0x51d   : > { %v4124_v6 = vand.u32 4294901760, %v4123_v9  ;;  %v9391_v9 = vld [vmem:[#allocation14_spill] sm:$0xff] }
 0x51e   : > { %6346 = vmatmul.mubr.f32.gmra.mrb[18].mxu1 %v8594_v51  ;;  %v3908_v26 = vsel %vm1618_vm0, %v9391_v9, 0 }
 0x51f   : > { %6348 = vmatprep.mubr.f32.mxu1 %v8619_v21  ;;  %v8805_v0 = vpack.c.bf16 %v4131_v7, %v4124_v6 }
 0x522   : > { %6349 = vmatmul.mubr.f32.gmra.mrb[20].mxu1 %v8615_v12 }
 0x523   : > { %6351 = vmatprep.mubr.f32.mxu1 %v8640_v37 }
 0x526   : > { %6352 = vmatmul.mubr.f32.gmra.mrb[22].mxu1 %v8636_v23 }
 0x527   : > { %6354 = vmatprep.mubr.f32.mxu1 %v8662_v31 }
 0x52a   : > { %6355 = vmatmul.mubr.f32.gmra.mrb[24].mxu1 %v8658_v22 }
 0x52b   : > { %6369 = vmatprep.mubr.f32.mxu1 %v8538_v36  ;;  %v3886_v36 = vsel %vm1618_vm0, %v8102_v8, 0 }
 0x52e   : > { %6370 = vmatmul.mubr.f32.vlgmr.msra.gmra.mrb[12].mxu1 %v8535_v27  ;;  %v3888_v27 = vsel %vm1618_vm0, %v8104_v48, 0 }
 0x52f   : > { %6831 = vmatpush3.bf16.msra.mxu1 %v8779_v16  ;;  %6372 = vmatprep.mubr.f32.mxu1 %v8558_v34  ;;  %v8822_v34 = vand.u32 4294901760, %v3886_v36  ;;  %v8832_v8 = vand.u32 4294901760, %v3888_v27 }
 0x530   : > { %6833 = vmatprep.subr.bf16.mxu1 %v8805_v0 }
 0x531   : > { %v8836_v48 = vsub.f32 %v3886_v36, %v8822_v34  ;;  %v8844_v57 = vsub.f32 %v3888_v27, %v8832_v8  ;;  %v8925_v36 = vand.u32 4294901760, %v3906_v62 }
 0x532   : > { %6373 = vmatmul.mubr.f32.gmra.mrb[14].mxu1 %v8554_v3  ;;  %v3892_v3 = vsel %vm1618_vm0, %v8114_v4, 0  ;;  %v3894_v4 = vsel %vm1618_vm0, %v8133_v53, 0 }
 0x533   : > { %6375 = vmatprep.mubr.f32.mxu1 %v8578_v56  ;;  %v8830_v56 = vsub.f32 %v3884_v50, %v8817_v38  ;;  %v8840_v55 = vand.u32 4294901760, %v3892_v3  ;;  %v3991_v33 = vand.u32 4294901760, %v8836_v48  ;;  %v8860_v60 = vand.u32 4294901760, %v3894_v4 }
 0x534   : > { %v4001_v5 = vand.u32 4294901760, %v8844_v57 }
 0x535   : > { %v8880_v29 = vsub.f32 %v3894_v4, %v8860_v60  ;;  %v8935_v4 = vsub.f32 %v3904_v30, %v8915_v28 }
 0x536   : > { %6376 = vmatmul.mubr.f32.gmra.mrb[16].mxu1 %v8574_v11  ;;  %v8838_v11 = vand.u32 4294901760, %v3890_v47 }
 0x537   : > { %6378 = vmatprep.mubr.f32.mxu1 %v8598_v46  ;;  %v9385_v46 = vld [vmem:[#allocation8_spill] sm:$0xff]  ;;  %v4031_v35 = vand.u32 4294901760, %v8880_v29 }
 0x538   : > { %v3896_v10 = vsel %vm1618_vm0, %v9385_v46, 0  ;;  %v8854_v14 = vsub.f32 %v3890_v47, %v8838_v11  ;;  %v9392_v46 = vld [vmem:[#allocation5_spill] sm:$0xff] }
 0x539   : > { %v8862_v53 = vand.u32 4294901760, %v3896_v10  ;;  %v4032_v27 = vsub.f32 %v8880_v29, %v4031_v35 }
 0x53a   : > { %6379 = vmatmul.mubr.f32.gmra.mrb[18].mxu1 %v8594_v51  ;;  %v3981_v51 = vand.u32 4294901760, %v8830_v56  ;;  %v4011_v49 = vand.u32 4294901760, %v8854_v14 }
 0x53b   : > { %6381 = vmatprep.mubr.f32.mxu1 %v8619_v21  ;;  %v8857_v21 = vsub.f32 %v3892_v3, %v8840_v55  ;;  %v8883_v39 = vsub.f32 %v3896_v10, %v8862_v53  ;;  %v4051_v3 = vand.u32 4294901760, %v8906_v63  ;;  %v3910_v10 = vsel %vm1618_vm0, %v9392_v46, 0 }
 0x53c   : > { %v4012_v41 = vsub.f32 %v8854_v14, %v4011_v49  ;;  %v8946_v25 = vand.u32 4294901760, %v3910_v10  ;;  %v4033_v18 = vand.u32 4294901760, %v4032_v27 }
 0x53d   : > { %v4021_v61 = vand.u32 4294901760, %v8857_v21  ;;  %v4041_v19 = vand.u32 4294901760, %v8883_v39 }
 0x53e   : > { %6382 = vmatmul.mubr.f32.gmra.mrb[20].mxu1 %v8615_v12  ;;  %v3982_v12 = vsub.f32 %v8830_v56, %v3981_v51  ;;  %v4013_v7 = vand.u32 4294901760, %v4012_v41  ;;  %v8959_v15 = vsub.f32 %v3910_v10, %v8946_v25 }
 0x53f   : > { %6384 = vmatprep.mubr.f32.mxu1 %v8640_v37  ;;  %v3992_v37 = vsub.f32 %v8836_v48, %v3991_v33  ;;  %v4022_v44 = vsub.f32 %v8857_v21, %v4021_v61  ;;  %v4042_v47 = vsub.f32 %v8883_v39, %v4041_v19 }
 0x540   : > { %v3983_v45 = vand.u32 4294901760, %v3982_v12  ;;  %v8944_v12 = vsub.f32 %v3906_v62, %v8925_v36 }
 0x541   : > { %v3993_v54 = vand.u32 4294901760, %v3992_v37  ;;  %v4023_v50 = vand.u32 4294901760, %v4022_v44  ;;  %v4052_v37 = vsub.f32 %v8906_v63, %v4051_v3 }
 0x542   : > { %6385 = vmatmul.mubr.f32.gmra.mrb[22].mxu1 %v8636_v23  ;;  %v3902_v23 = vsel %vm1618_vm0, %v9388_v40, 0  ;;  %v4091_v41 = vand.u32 4294901760, %v8944_v12 }
 0x543   : > { %6387 = vmatprep.mubr.f32.mxu1 %v8662_v31  ;;  %v4002_v31 = vsub.f32 %v8844_v57, %v4001_v5  ;;  %v8897_v17 = vand.u32 4294901760, %v3902_v23  ;;  %v4053_v30 = vand.u32 4294901760, %v4052_v37 }
 0x544   : > { %v4092_v9 = vsub.f32 %v8944_v12, %v4091_v41 }
 0x545   : > { %v4003_v58 = vand.u32 4294901760, %v4002_v31  ;;  %v8922_v6 = vsub.f32 %v3902_v23, %v8897_v17  ;;  %v4043_v23 = vand.u32 4294901760, %v4042_v47  ;;  %v4081_v31 = vand.u32 4294901760, %v8935_v4 }
 0x546   : > { %6388 = vmatmul.mubr.f32.gmra.mrb[24].mxu1 %v8658_v22  ;;  %v6836_v22 = vpack.c.bf16 %v8787_v59, %v8785_v24  ;;  %v4093_v27 = vand.u32 4294901760, %v4092_v9 }
 0x547   : > { %6394 = vmatprep.mubr.f32.mxu1 %v3983_v45  ;;  %v4071_v13 = vand.u32 4294901760, %v8922_v6  ;;  %v4062_v45 = vsub.f32 %v8913_v1, %v4061_v52  ;;  %v4082_v32 = vsub.f32 %v8935_v4, %v4081_v31 }
 0x549   : > { %v4063_v44 = vand.u32 4294901760, %v4062_v45 }
 0x54a   : > { %6395 = vmatmul.mubr.f32.vlgmr.msra.gmra.mrb[12].mxu1 %v3993_v54  ;;  %v4072_v54 = vsub.f32 %v8922_v6, %v4071_v13 }
 0x54b   : > { %6835 = vmatpush3.bf16.msra.mxu1 %v8805_v0  ;;  %6397 = vmatprep.mubr.f32.mxu1 %v4003_v58  ;;  %v8937_v0 = vand.u32 4294901760, %v3908_v26 }
 0x54c   : > { %6837 = vmatprep.subr.bf16.mxu1 %v6836_v22  ;;  %v4073_v58 = vand.u32 4294901760, %v4072_v54 }
 0x54d   : > { %v8952_v40 = vsub.f32 %v3908_v26, %v8937_v0  ;;  %v4111_v26 = vand.u32 4294901760, %v8959_v15 }
 0x54e   : > { %6398 = vmatmul.mubr.f32.gmra.mrb[14].mxu1 %v4013_v7  ;;  %v4083_v7 = vand.u32 4294901760, %v4082_v32 }
 0x54f   : > { %6400 = vmatprep.mubr.f32.mxu1 %v4023_v50  ;;  %v4101_v62 = vand.u32 4294901760, %v8952_v40  ;;  %v4112_v47 = vsub.f32 %v8959_v15, %v4111_v26 }
 0x551   : > { %v4102_v50 = vsub.f32 %v8952_v40, %v4101_v62  ;;  %v4113_v10 = vand.u32 4294901760, %v4112_v47 }
 0x552   : > { %6401 = vmatmul.mubr.f32.gmra.mrb[16].mxu1 %v4033_v18 }
 0x553   : > { %6403 = vmatprep.mubr.f32.mxu1 %v4043_v23  ;;  %v4103_v46 = vand.u32 4294901760, %v4102_v50 }
 0x556   : > { %6404 = vmatmul.mubr.f32.gmra.mrb[18].mxu1 %v4053_v30 }
 0x557   : > { %6406 = vmatprep.mubr.f32.mxu1 %v4063_v44 }
 0x55a   : > { %6407 = vmatmul.mubr.f32.gmra.mrb[20].mxu1 %v4073_v58 }
 0x55b   : > { %6409 = vmatprep.mubr.f32.mxu1 %v4083_v7 }
 0x55e   : > { %6410 = vmatmul.mubr.f32.gmra.mrb[22].mxu1 %v4093_v27 }
 0x55f   : > { %6412 = vmatprep.mubr.f32.mxu1 %v4103_v46 }
 0x562   : > { %6413 = vmatmul.mubr.f32.gmra.mrb[24].mxu1 %v4113_v10 }
 0x563   : > { %6419 = vmatprep.mubr.f32.mxu1 %v8817_v38 }
 0x566   : > { %6420 = vmatmul.mubr.f32.vlgmr.msra.gmra.mrb[12].mxu1 %v8822_v34 }
 0x567   : > { %6839 = vmatpush3.bf16.msra.mxu1 %v6836_v22  ;;  %6422 = vmatprep.mubr.f32.mxu1 %v8832_v8  ;;  %v6844_v22 = vpack.c.bf16 %v4129_v2, %v4122_v43 }
 0x568   : > { %6841 = vmatprep.subr.bf16.mxu1 %v8779_v16 }
 0x56a   : > { %6423 = vmatmul.mubr.f32.gmra.mrb[14].mxu1 %v8838_v11 }
 0x56b   : > { %6425 = vmatprep.mubr.f32.mxu1 %v8840_v55 }
 0x56e   : > { %6426 = vmatmul.mubr.f32.gmra.mrb[16].mxu1 %v8860_v60 }
 0x56f   : > { %6428 = vmatprep.mubr.f32.mxu1 %v8862_v53 }
 0x572   : > { %6429 = vmatmul.mubr.f32.gmra.mrb[18].mxu1 %v8885_v20 }
 0x573   : > { %6431 = vmatprep.mubr.f32.mxu1 %v8889_v42 }
 0x576   : > { %6432 = vmatmul.mubr.f32.gmra.mrb[20].mxu1 %v8897_v17 }
 0x577   : > { %6434 = vmatprep.mubr.f32.mxu1 %v8915_v28 }
 0x57a   : > { %6435 = vmatmul.mubr.f32.gmra.mrb[22].mxu1 %v8925_v36 }
 0x57b   : > { %6437 = vmatprep.mubr.f32.mxu1 %v8937_v0 }
 0x57e   : > { %6438 = vmatmul.mubr.f32.gmra.mrb[24].mxu1 %v8946_v25 }
 0x57f   : > { %6444 = vmatprep.mubr.f32.mxu1 %v8830_v56 }
 0x582   : > { %6445 = vmatmul.mubr.f32.vlgmr.msra.gmra.mrb[12].mxu1 %v8836_v48 }
 0x583   : > { %6843 = vmatpush3.bf16.msra.mxu1 %v8779_v16  ;;  %6447 = vmatprep.mubr.f32.mxu1 %v8844_v57 }
 0x584   : > { %6845 = vmatprep.subr.bf16.mxu1 %v6844_v22 }
 0x586   : > { %6448 = vmatmul.mubr.f32.gmra.mrb[14].mxu1 %v8854_v14 }
 0x587   : > { %6450 = vmatprep.mubr.f32.mxu1 %v8857_v21 }
 0x58a   : > { %6451 = vmatmul.mubr.f32.gmra.mrb[16].mxu1 %v8880_v29 }
 0x58b   : > { %6453 = vmatprep.mubr.f32.mxu1 %v8883_v39 }
 0x58e   : > { %6454 = vmatmul.mubr.f32.gmra.mrb[18].mxu1 %v8906_v63 }
 0x58f   : > { %6456 = vmatprep.mubr.f32.mxu1 %v8913_v1 }
 0x592   : > { %6457 = vmatmul.mubr.f32.gmra.mrb[20].mxu1 %v8922_v6 }
 0x593   : > { %6459 = vmatprep.mubr.f32.mxu1 %v8935_v4 }
 0x596   : > { %6460 = vmatmul.mubr.f32.gmra.mrb[22].mxu1 %v8944_v12 }
 0x597   : > { %6462 = vmatprep.mubr.f32.mxu1 %v8952_v40 }
 0x59a   : > { %6463 = vmatmul.mubr.f32.gmra.mrb[24].mxu1 %v8959_v15 }
 0x59b   : > { %6469 = vmatprep.mubr.f32.mxu1 %v3981_v51 }
 0x59e   : > { %6470 = vmatmul.mubr.f32.vlgmr.msra.gmra.mrb[12].mxu1 %v3991_v33 }
 0x59f   : > { %6847 = vmatpush3.bf16.msra.mxu1 %v6844_v22  ;;  %6472 = vmatprep.mubr.f32.mxu1 %v4001_v5 }
 0x5a0   : > { %6849 = vmatprep.subr.bf16.mxu1 %v8779_v16 }
 0x5a2   : > { %6473 = vmatmul.mubr.f32.gmra.mrb[14].mxu1 %v4011_v49 }
 0x5a3   : > { %6475 = vmatprep.mubr.f32.mxu1 %v4021_v61 }
 0x5a6   : > { %6476 = vmatmul.mubr.f32.gmra.mrb[16].mxu1 %v4031_v35 }
 0x5a7   : > { %6478 = vmatprep.mubr.f32.mxu1 %v4041_v19 }
 0x5aa   : > { %6479 = vmatmul.mubr.f32.gmra.mrb[18].mxu1 %v4051_v3 }
 0x5ab   : > { %6481 = vmatprep.mubr.f32.mxu1 %v4061_v52 }
 0x5ae   : > { %6482 = vmatmul.mubr.f32.gmra.mrb[20].mxu1 %v4071_v13 }
 0x5af   : > { %6484 = vmatprep.mubr.f32.mxu1 %v4081_v31 }
 0x5b2   : > { %6485 = vmatmul.mubr.f32.gmra.mrb[22].mxu1 %v4091_v41 }
 0x5b3   : > { %6487 = vmatprep.mubr.f32.mxu1 %v4101_v62 }
 0x5b6   : > { %6488 = vmatmul.mubr.f32.gmra.mrb[24].mxu1 %v4111_v26 }
 0x5b7   : > { %6494 = vmatprep.mubr.f32.mxu1 %v8817_v38 }
 0x5ba   : > { %6495 = vmatmul.mubr.f32.vlgmr.msra.gmra.mrb[12].mxu1 %v8822_v34 }
 0x5bb   : > { %6851 = vmatpush3.bf16.msra.mxu1 %v8779_v16  ;;  %6497 = vmatprep.mubr.f32.mxu1 %v8832_v8 }
 0x5be   : > { %6498 = vmatmul.mubr.f32.gmra.mrb[14].mxu1 %v8838_v11 }
 0x5bf   : > { %6500 = vmatprep.mubr.f32.mxu1 %v8840_v55 }
 0x5c2   : > { %6501 = vmatmul.mubr.f32.gmra.mrb[16].mxu1 %v8860_v60 }
 0x5c3   : > { %6503 = vmatprep.mubr.f32.mxu1 %v8862_v53 }
 0x5c6   : > { %6504 = vmatmul.mubr.f32.gmra.mrb[18].mxu1 %v8885_v20 }
 0x5c7   : > { %6506 = vmatprep.mubr.f32.mxu1 %v8889_v42 }
 0x5ca   : > { %6507 = vmatmul.mubr.f32.gmra.mrb[20].mxu1 %v8897_v17 }
 0x5cb   : > { %6509 = vmatprep.mubr.f32.mxu1 %v8915_v28 }
 0x5ce   : > { %6510 = vmatmul.mubr.f32.gmra.mrb[22].mxu1 %v8925_v36 }
 0x5cf   : > { %6512 = vmatprep.mubr.f32.mxu1 %v8937_v0 }
 0x5d2   : > { %6513 = vmatmul.mubr.f32.gmra.mrb[24].mxu1 %v8946_v25 }
 0x5d3   : > { %6519 = vmatprep.mubr.f32.mxu1 %v8817_v38 }
 0x5d6   : > { %6520 = vmatmul.mubr.f32.vlgmr.msra.gmra.mrb[12].mxu1 %v8822_v34 }
 0x5d7   : > { %6522 = vmatprep.mubr.f32.mxu1 %v8832_v8 }
 0x5da   : > { %6523 = vmatmul.mubr.f32.gmra.mrb[14].mxu1 %v8838_v11 }
 0x5db   : > { %6525 = vmatprep.mubr.f32.mxu1 %v8840_v55 }
 0x5de   : > { %6526 = vmatmul.mubr.f32.gmra.mrb[16].mxu1 %v8860_v60 }
 0x5df   : > { %6528 = vmatprep.mubr.f32.mxu1 %v8862_v53 }
 0x5e2   : > { %6529 = vmatmul.mubr.f32.gmra.mrb[18].mxu1 %v8885_v20 }
 0x5e3   : > { %6531 = vmatprep.mubr.f32.mxu1 %v8889_v42 }
 0x5e6   : > { %6532 = vmatmul.mubr.f32.gmra.mrb[20].mxu1 %v8897_v17 }
 0x5e7   : > { %6534 = vmatprep.mubr.f32.mxu1 %v8915_v28 }
 0x5ea   : > { %6535 = vmatmul.mubr.f32.gmra.mrb[22].mxu1 %v8925_v36 }
 0x5eb   : > { %6537 = vmatprep.mubr.f32.mxu1 %v8937_v0 }
 0x5ee   : > { %6538 = vmatmul.mubr.f32.gmra.mrb[24].mxu1 %v8946_v25 }
 0x6a9   : > { %v6521_v16 = vpop.f32.mrb[12].mxu1 }
 0x6aa   : > { %4932 = vst.msk [vmem:[%s9068_s11 + $0x8] sm:$0xff] %vm4930_vm2, %v6521_v16  ;;  %v4848_v24 = vpop.f32.mrb[13].mxu1 }
 0x6ab   : > { %4931 = vst.msk [vmem:[%s9068_s11] sm:$0xff] %vm4930_vm2, %v4848_v24 }
 0x6ad   : > { %v6524_v59 = vpop.f32.mrb[14].mxu1 }
 0x6ae   : > { %4934 = vst.msk [vmem:[%s9068_s11 + $0x18] sm:$0xff] %vm4930_vm2, %v6524_v59  ;;  %v4860_v43 = vpop.f32.mrb[15].mxu1 }
 0x6af   : > { %4933 = vst.msk [vmem:[%s9068_s11 + $0x10] sm:$0xff] %vm4930_vm2, %v4860_v43 }
 0x6b1   : > { %v6527_v2 = vpop.f32.mrb[16].mxu1 }
 0x6b2   : > { %4936 = vst.msk [vmem:[%s9068_s11 + $0x28] sm:$0xff] %vm4930_vm2, %v6527_v2  ;;  %v4872_v38 = vpop.f32.mrb[17].mxu1 }
 0x6b3   : > { %4935 = vst.msk [vmem:[%s9068_s11 + $0x20] sm:$0xff] %vm4930_vm2, %v4872_v38 }
 0x6b5   : > { %v6530_v34 = vpop.f32.mrb[18].mxu1 }
 0x6b6   : > { %4938 = vst.msk [vmem:[%s9068_s11 + $0x38] sm:$0xff] %vm4930_vm2, %v6530_v34  ;;  %v4884_v56 = vpop.f32.mrb[19].mxu1 }
 0x6b7   : > { %4937 = vst.msk [vmem:[%s9068_s11 + $0x30] sm:$0xff] %vm4930_vm2, %v4884_v56 }
 0x6b9   : > { %v6533_v8 = vpop.f32.mrb[20].mxu1 }
 0x6ba   : > { %4940 = vst.msk [vmem:[%s9068_s11 + $0x48] sm:$0xff] %vm4930_vm2, %v6533_v8  ;;  %v4896_v48 = vpop.f32.mrb[21].mxu1 }
 0x6bb   : > { %4939 = vst.msk [vmem:[%s9068_s11 + $0x40] sm:$0xff] %vm4930_vm2, %v4896_v48 }
 0x6bd   : > { %v6536_v11 = vpop.f32.mrb[22].mxu1  ;;  %4951 = sbr.rel (!%p7447_p4) target bundleno = 1793 (0x701), region = 44 }
 0x6be   : > { %4942 = vst.msk [vmem:[%s9068_s11 + $0x58] sm:$0xff] %vm4930_vm2, %v6536_v11  ;;  %v4908_v55 = vpop.f32.mrb[23].mxu1 }
 0x6bf   : > { %4941 = vst.msk [vmem:[%s9068_s11 + $0x50] sm:$0xff] %vm4930_vm2, %v4908_v55 }
 0x6c1   : > { %v6539_v57 = vpop.f32.mrb[24].mxu1 }
 0x6c2   : > { %4944 = vst.msk [vmem:[%s9068_s11 + $0x68] sm:$0xff] %vm4930_vm2, %v6539_v57  ;;  %v4920_v51 = vpop.f32.mrb[25].mxu1 }
 0x6c3   : > { %4943 = vst.msk [vmem:[%s9068_s11 + $0x60] sm:$0xff] %vm4930_vm2, %v4920_v51 }
 0x6c4   : > { %s9400_s18 = smov (!%p4954_p8, %s4953_s18), 14 }
 0x6c5   : > { %s5219_s16 = sshll.u32 %s9400_s18, 7 }
 0x6c6   : > { %p5222_p9 = scmp.eq.s32.totalorder %s5219_s16, 0 }
 0x6c7   : > { %7297 = sdivrem.u32 (!%p5222_p9), %s9400_s18, 14 }
 0x6c8   : > { %4962 = sbr.rel (%p5222_p9) target bundleno = 1793 (0x701), region = 48 }
 0x6d0   : > { %s9111_s26 = spop.drf %7297 }
 0x6d1   : > { %p5223_p10 = scmp.le.s32.totalorder %s9111_s26, 0 }
 0x6d2   : > { %s9393_s21 = smov (!%p5223_p10), %s9105_s15  ;;  %s9394_s8 = smov (!%p5223_p10), %s9068_s11 }
 0x6d3   : > { %5170 = sbr.rel (%p5223_p10) target bundleno = 1764 (0x6e4), region = 124  ;;  %s9120_s17 = smov (!%p5223_p10), 0  }
 0x6d4   : > { %s9122_s20 = smov (!%p5223_p10), 0  }
 0x6da LB: >> { %v5052_v33 = vld [vmem:[%s7363_s8] sm:$0xff]  ;;  %v5054_v14 = vld [vmem:[%s7363_s8 + $0x8] sm:$0xff]  ;;  %v5056_v21 = vld [vmem:[%s7363_s8 + $0x10] sm:$0xff]  ;;  %s5080_s23 = sadd.s32 1, %s7367_s17  ;;  %s5046_s20 = sadd.s32 1, %s7371_s20   ;;  %s7371_s20 = sphi %s9122_s20, %s5046_s20   ;;  %s7367_s17 = sphi %s9120_s17, %s9395_s17   ;;  %s7363_s8 = sphi %s9394_s8, %s5085_s8   ;;  %s7359_s21 = sphi %s9393_s21, %s5086_s21  }
 0x6db   : >> { %5053 = vst [vmem:[%s7359_s21] sm:$0xff] %v5052_v33  ;;  %5055 = vst [vmem:[%s7359_s21 + $0x8] sm:$0xff] %v5054_v14  ;;  %v5058_v60 = vld [vmem:[%s7363_s8 + $0x18] sm:$0xff]  ;;  %v5060_v53 = vld [vmem:[%s7363_s8 + $0x20] sm:$0xff]  ;;  %p5081_p11 = scmp.ge.s32.totalorder %s5080_s23, %s9111_s26  ;;  %p5045_p12 = scmp.ge.s32.totalorder %s5046_s20, %s9111_s26 }
 0x6dc   : >> { %5057 = vst [vmem:[%s7359_s21 + $0x10] sm:$0xff] %v5056_v21  ;;  %v5062_v5 = vld [vmem:[%s7363_s8 + $0x28] sm:$0xff]  ;;  %5059 = vst [vmem:[%s7359_s21 + $0x18] sm:$0xff] %v5058_v60  ;;  %v5064_v49 = vld [vmem:[%s7363_s8 + $0x30] sm:$0xff] }
 0x6dd   : >> { %5061 = vst [vmem:[%s7359_s21 + $0x20] sm:$0xff] %v5060_v53  ;;  %5063 = vst [vmem:[%s7359_s21 + $0x28] sm:$0xff] %v5062_v5  ;;  %v5066_v61 = vld [vmem:[%s7363_s8 + $0x38] sm:$0xff]  ;;  %v5068_v29 = vld [vmem:[%s7363_s8 + $0x40] sm:$0xff]  ;;  %s9402_s23 = smov (%p5081_p11, %s5080_s23), 0  ;;  %5048 = sbr.rel (!%p5045_p12) target bundleno = 1754 (0x6da), region = 130 }
 0x6de   : >> { %5065 = vst [vmem:[%s7359_s21 + $0x30] sm:$0xff] %v5064_v49  ;;  %5067 = vst [vmem:[%s7359_s21 + $0x38] sm:$0xff] %v5066_v61  ;;  %v5070_v39 = vld [vmem:[%s7363_s8 + $0x48] sm:$0xff]  ;;  %v5072_v20 = vld [vmem:[%s7363_s8 + $0x50] sm:$0xff]  ;;  %s5083_s24 = smul.u32 112, %s9402_s23  ;;  %s9395_s17 = smov %s9402_s23 }
 0x6df   : >> { %5069 = vst [vmem:[%s7359_s21 + $0x40] sm:$0xff] %v5068_v29  ;;  %v5074_v42 = vld [vmem:[%s7363_s8 + $0x58] sm:$0xff]  ;;  %5071 = vst [vmem:[%s7359_s21 + $0x48] sm:$0xff] %v5070_v39  ;;  %v5076_v17 = vld [vmem:[%s7363_s8 + $0x60] sm:$0xff] }
 0x6e0   : >> { %5073 = vst [vmem:[%s7359_s21 + $0x50] sm:$0xff] %v5072_v20  ;;  %5075 = vst [vmem:[%s7359_s21 + $0x58] sm:$0xff] %v5074_v42  ;;  %v5078_v63 = vld [vmem:[%s7363_s8 + $0x68] sm:$0xff]  ;;  %s5085_s8 = scalar_lea.vmem %s9068_s11, %s5083_s24 [#allocation2]  }
 0x6e1   : >> { %5077 = vst [vmem:[%s7359_s21 + $0x60] sm:$0xff] %v5076_v17  ;;  %5079 = vst [vmem:[%s7359_s21 + $0x68] sm:$0xff] %v5078_v63  ;;  %s5086_s21 = scalar_lea.vmem %s9105_s15, %s5083_s24  }
 0x6e4 PF: > { %7299 = sdivrem.u32 %s9400_s18, 14 }
 0x6e5   : > { %s5224_s27 = smul.u32 112, %s9111_s26 }
 0x6e7   : > { %s5091_s28 = scalar_lea.vmem %s9068_s11, %s5224_s27 [#allocation2]   ;;  %s5093_s29 = scalar_lea.vmem %s9105_s15, %s5224_s27  }
 0x6ed   : > { %s7300_s30 = spop.drf %7299 }
 0x6ee   : > { %p5226_p13 = scmp.le.s32.totalorder %s7300_s30, 0 }
 0x6ef   : > { %s7373_s6 = smov (!%p5226_p13), %s5093_s29   ;;  %s7377_s7 = smov (!%p5226_p13), %s5091_s28  }
 0x6f0   : > { %5184 = sbr.rel (%p5226_p13) target bundleno = 1793 (0x701), region = 135  ;;  %s7381_s9 = smov (!%p5226_p13), 0  }
 0x6f1   : > { %s7385_s10 = smov (!%p5226_p13), 0  }
 0x6f7 LB: >> { %v5103_v35 = vld [vmem:[%s7379_s7] sm:$0xff]  ;;  %s5105_s12 = sadd.s32 1, %s7383_s9  ;;  %s5097_s10 = sadd.s32 1, %s7387_s10   ;;  %s7387_s10 = sphi %s7385_s10, %s5097_s10   ;;  %s7383_s9 = sphi %s7381_s9, %s7382_s9   ;;  %s7379_s7 = sphi %s7377_s7, %s5110_s7   ;;  %s7375_s6 = sphi %s7373_s6, %s5111_s6  }
 0x6f8   : >> { %5104 = vst [vmem:[%s7375_s6] sm:$0xff] %v5103_v35  ;;  %p5106_p0 = scmp.ge.s32.totalorder %s5105_s12, %s7300_s30  ;;  %p5096_p1 = scmp.ge.s32.totalorder %s5097_s10, %s7300_s30 }
 0x6fa   : >> { %s9404_s12 = smov (%p5106_p0, %s5105_s12), 0  ;;  %5099 = sbr.rel (!%p5096_p1) target bundleno = 1783 (0x6f7), region = 141 }
 0x6fb   : >> { %s5227_s11 = sshll.u32 %s9404_s12, 3  ;;  %s7382_s9 = smov %s9404_s12  }
 0x6fc   : >> { %s5110_s7 = scalar_lea.vmem %s5091_s28, %s5227_s11 [#allocation2]   ;;  %s5111_s6 = scalar_lea.vmem %s5093_s29, %s5227_s11  }
 0x701 PF: > { %p12_p2 = scmp.ge.s32.totalorder %s7437_s22, 4   ;;  %s9396_s18 = smov %s7351_s19 }
 0x702   : > { %s9397_s19 = smov %s7445_s25  ;;  %s9398_s20 = smov %s7437_s22 }
 0x703   :  { %14 = sbr.rel (!%p12_p2) target bundleno = 2 (0x2), region = 152 }

</bundles_post_ra>
